<compile_context>
chip_gen: v5e
topology: v5e:2x2
jax: 0.10.0
libtpu: 0.0.40
codegen_flags: <defaults>
</compile_context>

<pallas_src>
import functools

import numpy as np
import jax
import jax.numpy as jnp
from jax.experimental import pallas as pl
from jax.experimental.pallas import tpu as pltpu

# ----------------------------------------------------------------------------
# FACEMESH index constants (synthetic but structurally faithful: 40 lip ids +
# 91 face ids, ROI = union of 131 ids).
# ----------------------------------------------------------------------------
FACEMESH_LIPS_IDX = list(range(0, 80, 2))                                    # 40 ids
FACEMESH_FACES_IDX = sorted(set(range(131)) - set(FACEMESH_LIPS_IDX))        # 91 ids
FACEMESH_ROI_IDX = sorted(set(FACEMESH_LIPS_IDX) | set(FACEMESH_FACES_IDX))  # 131 ids

mapped_faces_indices = [FACEMESH_ROI_IDX.index(i) for i in FACEMESH_FACES_IDX]
mapped_lips_indices = [FACEMESH_ROI_IDX.index(i) for i in FACEMESH_LIPS_IDX]

N_ROI = len(FACEMESH_ROI_IDX)      # 131
N_LIPS = len(FACEMESH_LIPS_IDX)    # 40
N_FACES = len(FACEMESH_FACES_IDX)  # 91

# logical / lane-padded widths
D_AUDIO = 80
D_LLFS = 32
D_AL_PAD = 128                      # audio||llfs (112) padded to 128
D_LM = 2 * N_ROI                    # 262
D_LM_PAD = 384                      # 262 -> 384
D_LIP = 2 * N_LIPS                  # 80
D_FACE = 2 * N_FACES                # 182
HID = 128
LM_HID = 256

ALPHA, BETA, GAMMA = 1.0, 0.5, 0.5


# ----------------------------------------------------------------------------
# Constant scatter matrices (built once; folded into decoder weights at init)
# and the lip-coordinate mask used by the loss.
# ----------------------------------------------------------------------------
def _scatter_matrices():
    scat_m = np.zeros((D_LIP, D_LM_PAD), np.float32)
    for i, roi in enumerate(mapped_lips_indices):
        scat_m[2 * i, 2 * roi] = 1.0
        scat_m[2 * i + 1, 2 * roi + 1] = 1.0
    scat_f = np.zeros((D_FACE, D_LM_PAD), np.float32)
    for i, roi in enumerate(mapped_faces_indices):
        scat_f[2 * i, 2 * roi] = 1.0
        scat_f[2 * i + 1, 2 * roi + 1] = 1.0
    return scat_m, scat_f


def _lips_mask():
    m = np.zeros((D_LM_PAD,), np.float32)
    for roi in mapped_lips_indices:
        m[2 * roi] = 1.0
        m[2 * roi + 1] = 1.0
    return m


# ----------------------------------------------------------------------------
# The single fused forward kernel.
#   al_ref   : (B*T, 128)  f32   audio||llfs, per-frame
#   lmgt_ref : (B*Tp+B, 384) f32  rows [0, B*Tp) = prev landmarks, rows [B*Tp, B*Tp+B) = gt
#   w256_ref : (896, 256)  bf16  [w1_al(128) ; w1_lm(384) ; w_dec1(384)]
#   w384_ref : (768, 384)  bf16  [w2_enc(512) ; w_dec2_scattered(256)]
#   bias_ref : (8, 384)    f32   rows: b1_al, b1_lm, b2_enc, b_dec1, b_dec2_s, lips_mask
# ----------------------------------------------------------------------------
def _fused_forward_kernel(al_ref, lmgt_ref, w256_ref, w384_ref, bias_ref,
                          pred_ref, loss_ref, *, B, T, Tp, alpha, beta, gamma):
    f32 = jnp.float32
    bf16 = jnp.bfloat16

    def mm(x, w):
        # bf16 operands feed the MXU natively; f32 accumulation.
        return jnp.dot(x.astype(bf16), w, preferred_element_type=f32)

    # ---- static, tile-aligned weight views (bf16 slabs) ----
    w1_al = w256_ref[0:128, :]        # (128, 256) block-diag(audio_w1, llfs_w1)
    w1_lm = w256_ref[128:512, :]      # (384, 256) landmark layer 1
    w_dec1 = w256_ref[512:896, :]     # (384, 256) both decoders, layer 1
    w2_enc = w384_ref[0:512, :]       # (512, 384) block-diag encoder layer 2
    w_dec2 = w384_ref[512:768, :]     # (256, 384) both decoders layer 2, scatter folded

    # ---- bias / mask rows (f32 slab) ----
    b1_al = bias_ref[0:1, 0:256]
    b1_lm = bias_ref[1:2, 0:256]
    b2_enc = bias_ref[2:3, :]
    b_dec1 = bias_ref[3:4, 0:256]
    b_dec2 = bias_ref[4:5, :]
    lips_mask = bias_ref[5:6, :]

    lm_in = lmgt_ref[0:B * Tp, :]             # (B*Tp, 384)
    gt = lmgt_ref[B * Tp:B * Tp + B, :]       # (B, 384)

    # ---- encoder layer 1 (per frame), ReLU ----
    h_al = jnp.maximum(mm(al_ref[...], w1_al) + b1_al, 0.0)   # (B*T, 256)  [audio|llfs]
    h_lm = jnp.maximum(mm(lm_in, w1_lm) + b1_lm, 0.0)          # (B*Tp, 256)

    # ---- temporal mean pool (XLU sublane sums + f32 scale; no MXU, no pool matrices) ----
    # Hoisted before encoder layer 2 (exact: that layer is affine).
    def pool(h, steps):
        rows = [jnp.sum(h[b * steps:(b + 1) * steps, :], axis=0, keepdims=True)
                for b in range(B)]
        return jnp.concatenate(rows, axis=0) * f32(1.0 / steps)   # (B, 256)

    pooled = jnp.concatenate([pool(h_al, T), pool(h_lm, Tp)], axis=-1)   # (B, 512)

    # ---- encoder layer 2 (block-diag fused: audio | llfs | landmark) ----
    feats = mm(pooled, w2_enc) + b2_enc                                  # (B, 384)

    # ---- decoder layer 1 (both decoders fused; concat-feature form) ----
    h_dec = jnp.maximum(mm(feats, w_dec1) + b_dec1, 0.0)                 # (B, 256) [mouth|face]

    # ---- decoder layer 2 + lip/face scatter (folded into the weights) ----
    pred = mm(h_dec, w_dec2) + b_dec2                                    # (B, 384)
    pred_ref[...] = pred

    # ---- CustomLoss: alpha*MSE + beta*L1 + gamma*MSE(lip landmarks) ----
    # Padded columns are exactly zero in both pred and gt, so full-width sums are exact.
    # TODO(synk): contrastive terms of the upstream CustomLoss are not in the reference.
    d = pred - gt
    sq = d * d
    mse = jnp.sum(sq) * (1.0 / (B * D_LM))
    l1 = jnp.sum(jnp.abs(d)) * (1.0 / (B * D_LM))
    lips_mse = jnp.sum(sq * lips_mask) * (1.0 / (B * D_LIP))
    loss_ref[0, 0] = alpha * mse + beta * l1 + gamma * lips_mse


# ----------------------------------------------------------------------------
# Parameter construction: PyTorch-Linear-style init, then fold / pack / bf16-cast
# once at init time into three slabs (2 bf16 weight slabs + 1 f32 bias slab).
# ----------------------------------------------------------------------------
def _init_linear(key, d_in, d_out):
    k1, k2 = jax.random.split(key)
    scale = 1.0 / (d_in ** 0.5)
    w = jax.random.uniform(k1, (d_in, d_out), jnp.float32, -scale, scale)
    b = jax.random.uniform(k2, (1, d_out), jnp.float32, -scale, scale)
    return w, b


def init_model_params(key):
    ks = jax.random.split(key, 10)
    # AudioEncoder(dim_in=80): 80 -> 128 -> 128
    a_w1, a_b1 = _init_linear(ks[0], D_AUDIO, HID)
    a_w2, a_b2 = _init_linear(ks[1], HID, HID)
    # AudioEncoder(dim_in=32): 32 -> 128 -> 128
    f_w1, f_b1 = _init_linear(ks[2], D_LLFS, HID)
    f_w2, f_b2 = _init_linear(ks[3], HID, HID)
    # LandmarkEncoder((131,2),128,256): 262 -> 256 -> 128
    m_w1, m_b1 = _init_linear(ks[4], D_LM, LM_HID)
    m_w2, m_b2 = _init_linear(ks[5], LM_HID, HID)
    # LandmarkDecoder(256,128,80)
    dm_w1, dm_b1 = _init_linear(ks[6], 2 * HID, HID)
    dm_w2, dm_b2 = _init_linear(ks[7], HID, D_LIP)
    # LandmarkDecoder(256,128,182)
    df_w1, df_b1 = _init_linear(ks[8], 2 * HID, HID)
    df_w2, df_b2 = _init_linear(ks[9], HID, D_FACE)

    # -- block-diag layer-1 for fused audio||llfs input (K padded 112->128) --
    w1_al = jnp.zeros((D_AL_PAD, 256), jnp.float32)
    w1_al = w1_al.at[0:D_AUDIO, 0:128].set(a_w1)
    w1_al = w1_al.at[D_AUDIO:D_AUDIO + D_LLFS, 128:256].set(f_w1)

    # -- landmark layer-1 (K padded 262->384) --
    w1_lm = jnp.zeros((D_LM_PAD, 256), jnp.float32).at[0:D_LM, :].set(m_w1)

    # -- block-diag encoder layer-2: [audio|llfs|landmark] pooled (B,512) -> feats (B,384) --
    w2_enc = jnp.zeros((512, 384), jnp.float32)
    w2_enc = w2_enc.at[0:128, 0:128].set(a_w2)
    w2_enc = w2_enc.at[128:256, 128:256].set(f_w2)
    w2_enc = w2_enc.at[256:512, 256:384].set(m_w2)

    # -- both decoder layer-1s fused: feats (B,384) -> [h_mouth|h_face] (B,256) --
    w_dec1 = jnp.zeros((384, 256), jnp.float32)
    w_dec1 = w_dec1.at[0:128, 0:128].set(dm_w1[0:128])       # audio feat -> mouth hidden
    w_dec1 = w_dec1.at[128:256, 128:256].set(df_w1[0:128])   # llfs  feat -> face hidden
    w_dec1 = w_dec1.at[256:384, 0:128].set(dm_w1[128:256])   # lm    feat -> mouth hidden
    w_dec1 = w_dec1.at[256:384, 128:256].set(df_w1[128:256])  # lm   feat -> face hidden

    # -- decoder layer-2 with the lip/face one-hot scatter folded in (exact, f32) --
    scat_m, scat_f = _scatter_matrices()
    w_dec2_s = jnp.concatenate([dm_w2 @ scat_m, df_w2 @ scat_f], axis=0)   # (256, 384)
    b_dec2_s = dm_b2 @ scat_m + df_b2 @ scat_f                              # (1, 384)

    # -- pack weights into two bf16 slabs (tile-aligned row offsets) --
    w256 = jnp.concatenate([w1_al, w1_lm, w_dec1], axis=0).astype(jnp.bfloat16)   # (896,256)
    w384 = jnp.concatenate([w2_enc, w_dec2_s], axis=0).astype(jnp.bfloat16)       # (768,384)

    # -- pack biases + lips mask into one f32 slab --
    bias = jnp.zeros((8, D_LM_PAD), jnp.float32)
    bias = bias.at[0, 0:256].set(jnp.concatenate([a_b1, f_b1], axis=-1)[0])
    bias = bias.at[1, 0:256].set(m_b1[0])
    bias = bias.at[2, :].set(jnp.concatenate([a_b2, f_b2, m_b2], axis=-1)[0])
    bias = bias.at[3, 0:256].set(jnp.concatenate([dm_b1, df_b1], axis=-1)[0])
    bias = bias.at[4, :].set(b_dec2_s[0])
    bias = bias.at[5, :].set(jnp.asarray(_lips_mask()))

    return {"w256": w256, "w384": w384, "bias": bias}


# ----------------------------------------------------------------------------
# Model.forward : one fused pallas_call (5 input DMAs, 5 MXU pushes).
# ----------------------------------------------------------------------------
@jax.jit
def model_forward(params, audio, llfs, landmark, gt_lm):
    B, T, _ = audio.shape
    Tp = landmark.shape[1]

    # Layout plumbing kept to two small ops: one fused audio||llfs slab and one
    # landmark||gt slab (lane-padded to 128 / 384).
    al = jnp.concatenate([audio.astype(jnp.float32).reshape(B * T, D_AUDIO),
                          llfs.astype(jnp.float32).reshape(B * T, D_LLFS)], axis=-1)
    al = jnp.pad(al, ((0, 0), (0, D_AL_PAD - (D_AUDIO + D_LLFS))))

    lmgt = jnp.concatenate([landmark.astype(jnp.float32).reshape(B * Tp, D_LM),
                            gt_lm.astype(jnp.float32).reshape(B, D_LM)], axis=0)
    lmgt = jnp.pad(lmgt, ((0, 0), (0, D_LM_PAD - D_LM)))

    vmem = pl.BlockSpec(memory_space=pltpu.MemorySpace.VMEM)
    smem = pl.BlockSpec(memory_space=pltpu.MemorySpace.SMEM)

    pred_padded, loss = pl.pallas_call(
        functools.partial(_fused_forward_kernel, B=B, T=T, Tp=Tp,
                          alpha=ALPHA, beta=BETA, gamma=GAMMA),
        out_shape=(jax.ShapeDtypeStruct((B, D_LM_PAD), jnp.float32),
                   jax.ShapeDtypeStruct((1, 1), jnp.float32)),
        in_specs=[vmem] * 5,
        out_specs=(vmem, smem),
    )(al, lmgt, params["w256"], params["w384"], params["bias"])

    pred_lm = pred_padded[:, :D_LM].reshape(B, N_ROI, 2)
    return pred_lm, loss[0, 0]


# ----------------------------------------------------------------------------
# main
# ----------------------------------------------------------------------------
if __name__ == "__main__":
    key = jax.random.PRNGKey(0)
    k_params, k_a, k_l, k_lm, k_gt = jax.random.split(key, 5)

    params = init_model_params(k_params)

    B, T, T_prev = 2, 8, 7
    audio = jax.random.normal(k_a, (B, T, 80), jnp.float32)
    llfs = jax.random.normal(k_l, (B, T, 32), jnp.float32)
    landmark = jax.random.uniform(k_lm, (B, T_prev, N_ROI, 2), jnp.float32)
    gt_lm = jax.random.uniform(k_gt, (B, N_ROI, 2), jnp.float32)

    pred_lm, loss = model_forward(params, audio, llfs, landmark, gt_lm)
    jax.block_until_ready((pred_lm, loss))

    assert pred_lm.shape == (B, N_ROI, 2)
    assert loss.shape == ()
    assert bool(jnp.isfinite(loss))
    assert bool(jnp.all(jnp.isfinite(pred_lm)))
    print("KERNEL_OK")
</pallas_src>

<mosaic_0001>
module attributes {stable_mosaic.version = 11 : i64} {
  func.func @_fused_forward_kernel(%arg0: memref<16x128xf32, #tpu.memory_space<vmem>>, %arg1: memref<16x384xf32, #tpu.memory_space<vmem>>, %arg2: memref<896x256xbf16, #tpu.memory_space<vmem>>, %arg3: memref<768x384xbf16, #tpu.memory_space<vmem>>, %arg4: memref<8x384xf32, #tpu.memory_space<vmem>>, %arg5: memref<2x384xf32, #tpu.memory_space<vmem>>, %arg6: memref<1x1xf32, #tpu.memory_space<smem>>) attributes {dimension_semantics = [], scalar_prefetch = 0 : i64, scratch_operands = 0 : i64, tpu.core_type = #tpu.core_type<tc>} {
    %c0 = arith.constant 0 : index
    %c0_0 = arith.constant 0 : index
    %0 = vector.load %arg2[%c0, %c0_0] : memref<896x256xbf16, #tpu.memory_space<vmem>>, vector<128x256xbf16>
    %c128 = arith.constant 128 : index
    %c0_1 = arith.constant 0 : index
    %1 = vector.load %arg2[%c128, %c0_1] : memref<896x256xbf16, #tpu.memory_space<vmem>>, vector<384x256xbf16>
    %c512 = arith.constant 512 : index
    %c0_2 = arith.constant 0 : index
    %2 = vector.load %arg2[%c512, %c0_2] : memref<896x256xbf16, #tpu.memory_space<vmem>>, vector<384x256xbf16>
    %c0_3 = arith.constant 0 : index
    %c0_4 = arith.constant 0 : index
    %3 = vector.load %arg3[%c0_3, %c0_4] : memref<768x384xbf16, #tpu.memory_space<vmem>>, vector<512x384xbf16>
    %c512_5 = arith.constant 512 : index
    %c0_6 = arith.constant 0 : index
    %4 = vector.load %arg3[%c512_5, %c0_6] : memref<768x384xbf16, #tpu.memory_space<vmem>>, vector<256x384xbf16>
    %c0_7 = arith.constant 0 : index
    %c0_8 = arith.constant 0 : index
    %5 = vector.load %arg4[%c0_7, %c0_8] : memref<8x384xf32, #tpu.memory_space<vmem>>, vector<1x256xf32>
    %c1 = arith.constant 1 : index
    %c0_9 = arith.constant 0 : index
    %6 = vector.load %arg4[%c1, %c0_9] : memref<8x384xf32, #tpu.memory_space<vmem>>, vector<1x256xf32>
    %c2 = arith.constant 2 : index
    %c0_10 = arith.constant 0 : index
    %7 = vector.load %arg4[%c2, %c0_10] : memref<8x384xf32, #tpu.memory_space<vmem>>, vector<1x384xf32>
    %c3 = arith.constant 3 : index
    %c0_11 = arith.constant 0 : index
    %8 = vector.load %arg4[%c3, %c0_11] : memref<8x384xf32, #tpu.memory_space<vmem>>, vector<1x256xf32>
    %c4 = arith.constant 4 : index
    %c0_12 = arith.constant 0 : index
    %9 = vector.load %arg4[%c4, %c0_12] : memref<8x384xf32, #tpu.memory_space<vmem>>, vector<1x384xf32>
    %c5 = arith.constant 5 : index
    %c0_13 = arith.constant 0 : index
    %10 = vector.load %arg4[%c5, %c0_13] : memref<8x384xf32, #tpu.memory_space<vmem>>, vector<1x384xf32>
    %c0_14 = arith.constant 0 : index
    %c0_15 = arith.constant 0 : index
    %11 = vector.load %arg1[%c0_14, %c0_15] : memref<16x384xf32, #tpu.memory_space<vmem>>, vector<14x384xf32>
    %c14 = arith.constant 14 : index
    %c0_16 = arith.constant 0 : index
    %12 = vector.load %arg1[%c14, %c0_16] : memref<16x384xf32, #tpu.memory_space<vmem>>, vector<2x384xf32>
    %c0_17 = arith.constant 0 : index
    %c0_18 = arith.constant 0 : index
    %13 = vector.load %arg0[%c0_17, %c0_18] : memref<16x128xf32, #tpu.memory_space<vmem>>, vector<16x128xf32>
    %14 = arith.truncf %13 : vector<16x128xf32> to vector<16x128xbf16>
    %cst = arith.constant dense<0.000000e+00> : vector<16x256xf32>
    %15 = tpu.matmul %14, %0, %cst {dimension_numbers = #tpu.dot_dimension_numbers<[1], [0], [0], [1], [0, 0, 1, 1], [], []>} : vector<16x128xbf16>, vector<128x256xbf16>, vector<16x256xf32> -> vector<16x256xf32>
    %16 = vector.broadcast %5 : vector<1x256xf32> to vector<16x256xf32>
    %17 = arith.addf %15, %16 : vector<16x256xf32>
    %cst_19 = arith.constant 0.000000e+00 : f32
    %18 = vector.broadcast %cst_19 : f32 to vector<16x256xf32>
    %19 = arith.maximumf %17, %18 : vector<16x256xf32>
    %20 = arith.truncf %11 : vector<14x384xf32> to vector<14x384xbf16>
    %cst_20 = arith.constant dense<0.000000e+00> : vector<14x256xf32>
    %21 = tpu.matmul %20, %1, %cst_20 {dimension_numbers = #tpu.dot_dimension_numbers<[1], [0], [0], [1], [0, 0, 1, 1], [], []>} : vector<14x384xbf16>, vector<384x256xbf16>, vector<14x256xf32> -> vector<14x256xf32>
    %22 = vector.broadcast %6 : vector<1x256xf32> to vector<14x256xf32>
    %23 = arith.addf %21, %22 : vector<14x256xf32>
    %cst_21 = arith.constant 0.000000e+00 : f32
    %24 = vector.broadcast %cst_21 : f32 to vector<14x256xf32>
    %25 = arith.maximumf %23, %24 : vector<14x256xf32>
    %26 = vector.extract_strided_slice %19 {offsets = [0, 0], sizes = [8, 256], strides = [1, 1]} : vector<16x256xf32> to vector<8x256xf32>
    %cst_22 = arith.constant dense<0.000000e+00> : vector<256xf32>
    %27 = vector.multi_reduction <add>, %26, %cst_22 [0] : vector<8x256xf32> to vector<256xf32>
    %28 = vector.shape_cast %27 : vector<256xf32> to vector<1x256xf32>
    %29 = vector.extract_strided_slice %19 {offsets = [8, 0], sizes = [8, 256], strides = [1, 1]} : vector<16x256xf32> to vector<8x256xf32>
    %cst_23 = arith.constant dense<0.000000e+00> : vector<256xf32>
    %30 = vector.multi_reduction <add>, %29, %cst_23 [0] : vector<8x256xf32> to vector<256xf32>
    %31 = vector.shape_cast %30 : vector<256xf32> to vector<1x256xf32>
    %32 = tpu.concatenate %28, %31 in 0 : vector<1x256xf32>, vector<1x256xf32> -> vector<2x256xf32>
    %cst_24 = arith.constant 1.250000e-01 : f32
    %33 = vector.broadcast %cst_24 : f32 to vector<2x256xf32>
    %34 = arith.mulf %32, %33 : vector<2x256xf32>
    %35 = vector.extract_strided_slice %25 {offsets = [0, 0], sizes = [7, 256], strides = [1, 1]} : vector<14x256xf32> to vector<7x256xf32>
    %cst_25 = arith.constant dense<0.000000e+00> : vector<256xf32>
    %36 = vector.multi_reduction <add>, %35, %cst_25 [0] : vector<7x256xf32> to vector<256xf32>
    %37 = vector.shape_cast %36 : vector<256xf32> to vector<1x256xf32>
    %38 = vector.extract_strided_slice %25 {offsets = [7, 0], sizes = [7, 256], strides = [1, 1]} : vector<14x256xf32> to vector<7x256xf32>
    %cst_26 = arith.constant dense<0.000000e+00> : vector<256xf32>
    %39 = vector.multi_reduction <add>, %38, %cst_26 [0] : vector<7x256xf32> to vector<256xf32>
    %40 = vector.shape_cast %39 : vector<256xf32> to vector<1x256xf32>
    %41 = tpu.concatenate %37, %40 in 0 : vector<1x256xf32>, vector<1x256xf32> -> vector<2x256xf32>
    %cst_27 = arith.constant 0.142857149 : f32
    %42 = vector.broadcast %cst_27 : f32 to vector<2x256xf32>
    %43 = arith.mulf %41, %42 : vector<2x256xf32>
    %44 = tpu.concatenate %34, %43 in 1 : vector<2x256xf32>, vector<2x256xf32> -> vector<2x512xf32>
    %45 = arith.truncf %44 : vector<2x512xf32> to vector<2x512xbf16>
    %cst_28 = arith.constant dense<0.000000e+00> : vector<2x384xf32>
    %46 = tpu.matmul %45, %3, %cst_28 {dimension_numbers = #tpu.dot_dimension_numbers<[1], [0], [0], [1], [0, 0, 1, 1], [], []>} : vector<2x512xbf16>, vector<512x384xbf16>, vector<2x384xf32> -> vector<2x384xf32>
    %47 = vector.broadcast %7 : vector<1x384xf32> to vector<2x384xf32>
    %48 = arith.addf %46, %47 : vector<2x384xf32>
    %49 = arith.truncf %48 : vector<2x384xf32> to vector<2x384xbf16>
    %cst_29 = arith.constant dense<0.000000e+00> : vector<2x256xf32>
    %50 = tpu.matmul %49, %2, %cst_29 {dimension_numbers = #tpu.dot_dimension_numbers<[1], [0], [0], [1], [0, 0, 1, 1], [], []>} : vector<2x384xbf16>, vector<384x256xbf16>, vector<2x256xf32> -> vector<2x256xf32>
    %51 = vector.broadcast %8 : vector<1x256xf32> to vector<2x256xf32>
    %52 = arith.addf %50, %51 : vector<2x256xf32>
    %cst_30 = arith.constant 0.000000e+00 : f32
    %53 = vector.broadcast %cst_30 : f32 to vector<2x256xf32>
    %54 = arith.maximumf %52, %53 : vector<2x256xf32>
    %55 = arith.truncf %54 : vector<2x256xf32> to vector<2x256xbf16>
    %cst_31 = arith.constant dense<0.000000e+00> : vector<2x384xf32>
    %56 = tpu.matmul %55, %4, %cst_31 {dimension_numbers = #tpu.dot_dimension_numbers<[1], [0], [0], [1], [0, 0, 1, 1], [], []>} : vector<2x256xbf16>, vector<256x384xbf16>, vector<2x384xf32> -> vector<2x384xf32>
    %57 = vector.broadcast %9 : vector<1x384xf32> to vector<2x384xf32>
    %58 = arith.addf %56, %57 : vector<2x384xf32>
    %c0_32 = arith.constant 0 : index
    %c0_33 = arith.constant 0 : index
    %59 = vector.load %arg5[%c0_32, %c0_33] : memref<2x384xf32, #tpu.memory_space<vmem>>, vector<2x384xf32>
    tpu.vector_store %arg5[%c0_32, %c0_33], %58 {strides = array<i32>} : memref<2x384xf32, #tpu.memory_space<vmem>>, vector<2x384xf32>,
    %60 = arith.subf %58, %12 : vector<2x384xf32>
    %61 = arith.mulf %60, %60 : vector<2x384xf32>
    %62 = vector.shape_cast %61 : vector<2x384xf32> to vector<1x2x384xf32>
    %cst_34 = arith.constant dense<0.000000e+00> : vector<1xf32>
    %63 = vector.multi_reduction <add>, %62, %cst_34 [1, 2] : vector<1x2x384xf32> to vector<1xf32>
    %64 = vector.shape_cast %63 : vector<1xf32> to vector<1x1x1xf32>
    %65 = vector.extract %64[0, 0, 0] : f32 from vector<1x1x1xf32>
    %cst_35 = arith.constant 0.00190839695 : f32
    %66 = arith.mulf %65, %cst_35 : f32
    %67 = math.absf %60 : vector<2x384xf32>
    %68 = vector.shape_cast %67 : vector<2x384xf32> to vector<1x2x384xf32>
    %cst_36 = arith.constant dense<0.000000e+00> : vector<1xf32>
    %69 = vector.multi_reduction <add>, %68, %cst_36 [1, 2] : vector<1x2x384xf32> to vector<1xf32>
    %70 = vector.shape_cast %69 : vector<1xf32> to vector<1x1x1xf32>
    %71 = vector.extract %70[0, 0, 0] : f32 from vector<1x1x1xf32>
    %cst_37 = arith.constant 0.00190839695 : f32
    %72 = arith.mulf %71, %cst_37 : f32
    %73 = vector.broadcast %10 : vector<1x384xf32> to vector<2x384xf32>
    %74 = arith.mulf %61, %73 : vector<2x384xf32>
    %75 = vector.shape_cast %74 : vector<2x384xf32> to vector<1x2x384xf32>
    %cst_38 = arith.constant dense<0.000000e+00> : vector<1xf32>
    %76 = vector.multi_reduction <add>, %75, %cst_38 [1, 2] : vector<1x2x384xf32> to vector<1xf32>
    %77 = vector.shape_cast %76 : vector<1xf32> to vector<1x1x1xf32>
    %78 = vector.extract %77[0, 0, 0] : f32 from vector<1x1x1xf32>
    %cst_39 = arith.constant 6.250000e-03 : f32
    %79 = arith.mulf %78, %cst_39 : f32
    %cst_40 = arith.constant 1.000000e+00 : f32
    %80 = arith.mulf %cst_40, %66 : f32
    %cst_41 = arith.constant 5.000000e-01 : f32
    %81 = arith.mulf %cst_41, %72 : f32
    %82 = arith.addf %80, %81 : f32
    %cst_42 = arith.constant 5.000000e-01 : f32
    %83 = arith.mulf %cst_42, %79 : f32
    %84 = arith.addf %82, %83 : f32
    %c0_43 = arith.constant 0 : index
    %c0_44 = arith.constant 0 : index
    %85 = memref.load %arg6[%c0_43, %c0_44] : memref<1x1xf32, #tpu.memory_space<smem>>
    memref.store %84, %arg6[%c0_43, %c0_44] : memref<1x1xf32, #tpu.memory_space<smem>>
    return
  }
}

</mosaic_0001>

<bundles_post_ra>
// kernel: model_forward.1
= control target key start
LH: loop header
LB: loop body
LE: loop exit
PB: predicated region body
PF: predicated region fallthrough
CT: control target
= control target key end

     0   :  { %s5352_s0 = inlined_call_operand.vmem [shape: f32[16,128], index: 0, kind: input, shape index: {}]   ;;  %s5353_s1 = inlined_call_operand.vmem [shape: f32[16,384], index: 1, kind: input, shape index: {}]   ;;  %s5354_s2 = inlined_call_operand.vmem [shape: bf16[896,256], index: 2, kind: input, shape index: {}]   ;;  %s5355_s3 = inlined_call_operand.vmem [shape: bf16[768,384], index: 3, kind: input, shape index: {}]   ;;  %s5356_s4 = inlined_call_operand.vmem [shape: f32[8,384], index: 4, kind: input, shape index: {}]   ;;  %s5357_s5 = inlined_call_operand.vmem [shape: f32[2,384], index: 5, kind: output, shape index: {0}]   ;;  %s5358_s6 = inlined_call_operand.hbm [shape: f32[1,1], index: 6, kind: output, shape index: {1}]  }
   0x1   :  { %v2399_v0 = vld [vmem:[%s5354_s2 + $0x70] sm:$0xf]  ;;  %v3380_v1 = vld [vmem:[%s5354_s2 + $0x74] sm:$0xf0]  ;;  %v3379_v2 = vld [vmem:[%s5354_s2 + $0x74] sm:$0xf] }
   0x2   :  { %v2400_v3 = vor.u32 %v3380_v1, %v2399_v0  ;;  %v2401_v4 = vld [vmem:[%s5354_s2 + $0x78] sm:$0xf0]  ;;  %v2463_v5 = vld [vmem:[%s5354_s2 + $0xf0] sm:$0xf]  ;;  %v3396_v6 = vld [vmem:[%s5354_s2 + $0xf4] sm:$0xf0] }
   0x3   :  { %v2404_v7 = vor.u32 %v3379_v2, %v2401_v4  ;;  %v2464_v8 = vor.u32 %v3396_v6, %v2463_v5  ;;  %v2527_v9 = vld [vmem:[%s5354_s2 + $0x170] sm:$0xf]  ;;  %v3412_v10 = vld [vmem:[%s5354_s2 + $0x174] sm:$0xf0]  ;;  %v2391_v11 = vld [vmem:[%s5354_s2 + $0x60] sm:$0xf] }
   0x4   :  { %435 = vmatpush.bf16.msra.mxu0 %v2400_v3  ;;  %v2528_v12 = vor.u32 %v3412_v10, %v2527_v9  ;;  %v3378_v13 = vld [vmem:[%s5354_s2 + $0x64] sm:$0xf0]  ;;  %v3377_v14 = vld [vmem:[%s5354_s2 + $0x64] sm:$0xf]  ;;  %v2393_v15 = vld [vmem:[%s5354_s2 + $0x68] sm:$0xf0] }
   0x5   :  { %449 = vmatpush.bf16.msra.mxu1 %v2404_v7  ;;  %715 = vmatpush.bf16.msra.mxu2 %v2464_v8  ;;  %v2392_v16 = vor.u32 %v3378_v13, %v2391_v11  ;;  %v2396_v17 = vor.u32 %v3377_v14, %v2393_v15  ;;  %v2455_v18 = vld [vmem:[%s5354_s2 + $0xe0] sm:$0xf]  ;;  %v3394_v19 = vld [vmem:[%s5354_s2 + $0xe4] sm:$0xf0]  ;;  %v2383_v23 = vld [vmem:[%s5354_s2 + $0x50] sm:$0xf] }
   0x6   :  { %v2519_v20 = vld [vmem:[%s5354_s2 + $0x160] sm:$0xf]  ;;  %729 = vmatpush.bf16.msra.mxu3 %v2528_v12  ;;  %v2456_v21 = vor.u32 %v3394_v19, %v2455_v18  ;;  %v3410_v22 = vld [vmem:[%s5354_s2 + $0x164] sm:$0xf0]  ;;  %v3376_v24 = vld [vmem:[%s5354_s2 + $0x54] sm:$0xf0] }
   0x7   :  { %v2520_v25 = vor.u32 %v3410_v22, %v2519_v20  ;;  %v3375_v26 = vld [vmem:[%s5354_s2 + $0x54] sm:$0xf]  ;;  %v2385_v27 = vld [vmem:[%s5354_s2 + $0x58] sm:$0xf0]  ;;  %v2447_v28 = vld [vmem:[%s5354_s2 + $0xd0] sm:$0xf]  ;;  %v2384_v29 = vor.u32 %v3376_v24, %v2383_v23 }
   0x8   :  { %436 = vmatpush.bf16.msra.mxu0 %v2392_v16  ;;  %v3392_v30 = vld [vmem:[%s5354_s2 + $0xd4] sm:$0xf0]  ;;  %v2511_v31 = vld [vmem:[%s5354_s2 + $0x150] sm:$0xf]  ;;  %v2388_v33 = vor.u32 %v3375_v26, %v2385_v27  ;;  %v2375_v35 = vld [vmem:[%s5354_s2 + $0x40] sm:$0xf] }
   0x9   :  { %v3408_v32 = vld [vmem:[%s5354_s2 + $0x154] sm:$0xf0]  ;;  %450 = vmatpush.bf16.msra.mxu1 %v2396_v17  ;;  %716 = vmatpush.bf16.msra.mxu2 %v2456_v21  ;;  %v2448_v34 = vor.u32 %v3392_v30, %v2447_v28  ;;  %v3374_v36 = vld [vmem:[%s5354_s2 + $0x44] sm:$0xf0]  ;;  %v3373_v37 = vld [vmem:[%s5354_s2 + $0x44] sm:$0xf] }
   0xa   :  { %730 = vmatpush.bf16.msra.mxu3 %v2520_v25  ;;  %v2512_v38 = vor.u32 %v3408_v32, %v2511_v31  ;;  %v2377_v39 = vld [vmem:[%s5354_s2 + $0x48] sm:$0xf0]  ;;  %v2439_v40 = vld [vmem:[%s5354_s2 + $0xc0] sm:$0xf]  ;;  %v3390_v41 = vld [vmem:[%s5354_s2 + $0xc4] sm:$0xf0]  ;;  %v2376_v44 = vor.u32 %v3374_v36, %v2375_v35 }
   0xb   :  { %v2503_v42 = vld [vmem:[%s5354_s2 + $0x140] sm:$0xf]  ;;  %v3406_v43 = vld [vmem:[%s5354_s2 + $0x144] sm:$0xf0]  ;;  %v2380_v45 = vor.u32 %v3373_v37, %v2377_v39  ;;  %v2440_v46 = vor.u32 %v3390_v41, %v2439_v40  ;;  %v2367_v47 = vld [vmem:[%s5354_s2 + $0x30] sm:$0xf] }
   0xc   :  { %437 = vmatpush.bf16.msra.mxu0 %v2384_v29  ;;  %v3372_v48 = vld [vmem:[%s5354_s2 + $0x34] sm:$0xf0]  ;;  %v3371_v49 = vld [vmem:[%s5354_s2 + $0x34] sm:$0xf]  ;;  %v2504_v50 = vor.u32 %v3406_v43, %v2503_v42  ;;  %v2369_v51 = vld [vmem:[%s5354_s2 + $0x38] sm:$0xf0] }
   0xd   :  { %451 = vmatpush.bf16.msra.mxu1 %v2388_v33  ;;  %717 = vmatpush.bf16.msra.mxu2 %v2448_v34  ;;  %v2431_v52 = vld [vmem:[%s5354_s2 + $0xb0] sm:$0xf]  ;;  %v3388_v53 = vld [vmem:[%s5354_s2 + $0xb4] sm:$0xf0]  ;;  %v2368_v56 = vor.u32 %v3372_v48, %v2367_v47  ;;  %v2372_v57 = vor.u32 %v3371_v49, %v2369_v51  ;;  %v2359_v59 = vld [vmem:[%s5354_s2 + $0x20] sm:$0xf] }
   0xe   :  { %731 = vmatpush.bf16.msra.mxu3 %v2512_v38  ;;  %v2495_v54 = vld [vmem:[%s5354_s2 + $0x130] sm:$0xf]  ;;  %v3404_v55 = vld [vmem:[%s5354_s2 + $0x134] sm:$0xf0]  ;;  %v2432_v58 = vor.u32 %v3388_v53, %v2431_v52  ;;  %v3370_v60 = vld [vmem:[%s5354_s2 + $0x24] sm:$0xf0] }
   0xf   :  { %v3369_v61 = vld [vmem:[%s5354_s2 + $0x24] sm:$0xf]  ;;  %v2496_v62 = vor.u32 %v3404_v55, %v2495_v54  ;;  %v2361_v63 = vld [vmem:[%s5354_s2 + $0x28] sm:$0xf0]  ;;  %v2423_v0 = vld [vmem:[%s5354_s2 + $0xa0] sm:$0xf]  ;;  %v2360_v4 = vor.u32 %v3370_v60, %v2359_v59 }
  0x10   :  { %438 = vmatpush.bf16.msra.mxu0 %v2376_v44  ;;  %v3386_v1 = vld [vmem:[%s5354_s2 + $0xa4] sm:$0xf0]  ;;  %v2487_v2 = vld [vmem:[%s5354_s2 + $0x120] sm:$0xf]  ;;  %v2364_v5 = vor.u32 %v3369_v61, %v2361_v63  ;;  %v2351_v7 = vld [vmem:[%s5354_s2 + $0x10] sm:$0xf] }
  0x11   :  { %452 = vmatpush.bf16.msra.mxu1 %v2380_v45  ;;  %718 = vmatpush.bf16.msra.mxu2 %v2440_v46  ;;  %v3402_v3 = vld [vmem:[%s5354_s2 + $0x124] sm:$0xf0]  ;;  %v2424_v6 = vor.u32 %v3386_v1, %v2423_v0  ;;  %v3368_v8 = vld [vmem:[%s5354_s2 + $0x14] sm:$0xf0]  ;;  %v3367_v9 = vld [vmem:[%s5354_s2 + $0x14] sm:$0xf] }
  0x12   :  { %732 = vmatpush.bf16.msra.mxu3 %v2504_v50  ;;  %v2488_v10 = vor.u32 %v3402_v3, %v2487_v2  ;;  %v2353_v11 = vld [vmem:[%s5354_s2 + $0x18] sm:$0xf0]  ;;  %v2415_v12 = vld [vmem:[%s5354_s2 + $0x90] sm:$0xf]  ;;  %v3384_v13 = vld [vmem:[%s5354_s2 + $0x94] sm:$0xf0]  ;;  %v2352_v17 = vor.u32 %v3368_v8, %v2351_v7 }
  0x13   :  { %v2479_v14 = vld [vmem:[%s5354_s2 + $0x110] sm:$0xf]  ;;  %v3400_v15 = vld [vmem:[%s5354_s2 + $0x114] sm:$0xf0]  ;;  %v2343_v16 = vld [vmem:[%s5354_s2] sm:$0xf]  ;;  %v2356_v21 = vor.u32 %v3367_v9, %v2353_v11  ;;  %v2416_v22 = vor.u32 %v3384_v13, %v2415_v12 }
  0x14   :  { %439 = vmatpush.bf16.msra.mxu0 %v2368_v56  ;;  %v3366_v18 = vld [vmem:[%s5354_s2 + $0x4] sm:$0xf0]  ;;  %v3365_v19 = vld [vmem:[%s5354_s2 + $0x4] sm:$0xf]  ;;  %v2345_v20 = vld [vmem:[%s5354_s2 + $0x8] sm:$0xf0]  ;;  %v2480_v26 = vor.u32 %v3400_v15, %v2479_v14 }
  0x15   :  { %453 = vmatpush.bf16.msra.mxu1 %v2372_v57  ;;  %719 = vmatpush.bf16.msra.mxu2 %v2432_v58  ;;  %v2407_v23 = vld [vmem:[%s5354_s2 + $0x80] sm:$0xf]  ;;  %v3382_v24 = vld [vmem:[%s5354_s2 + $0x84] sm:$0xf0]  ;;  %v2591_v28 = vld [vmem:[%s5354_s2 + $0x1f0] sm:$0xf]  ;;  %v2344_v33 = vor.u32 %v3366_v18, %v2343_v16  ;;  %v2348_v37 = vor.u32 %v3365_v19, %v2345_v20 }
  0x16   :  { %733 = vmatpush.bf16.msra.mxu3 %v2496_v62  ;;  %v2471_v25 = vld [vmem:[%s5354_s2 + $0x100] sm:$0xf]  ;;  %v3398_v27 = vld [vmem:[%s5354_s2 + $0x104] sm:$0xf0]  ;;  %v3428_v29 = vld [vmem:[%s5354_s2 + $0x1f4] sm:$0xf0]  ;;  %v2408_v38 = vor.u32 %v3382_v24, %v2407_v23 }
  0x17   :  { %v3395_v30 = vld [vmem:[%s5354_s2 + $0xf4] sm:$0xf]  ;;  %v2465_v31 = vld [vmem:[%s5354_s2 + $0xf8] sm:$0xf0]  ;;  %v347_v39 = vld [vmem:[%s5352_s0] sm:$0xff]  ;;  %v2472_v42 = vor.u32 %v3398_v27, %v2471_v25  ;;  %v2592_v43 = vor.u32 %v3428_v29, %v2591_v28 }
  0x18   :  { %440 = vmatpush.bf16.msra.mxu0 %v2360_v4  ;;  %v3411_v32 = vld [vmem:[%s5354_s2 + $0x174] sm:$0xf]  ;;  %v2529_v34 = vld [vmem:[%s5354_s2 + $0x178] sm:$0xf0]  ;;  %v348_v40 = vld [vmem:[%s5352_s0 + $0x8] sm:$0xff]  ;;  %v2468_v47 = vor.u32 %v3395_v30, %v2465_v31 }
  0x19   :  { %454 = vmatpush.bf16.msra.mxu1 %v2364_v5  ;;  %720 = vmatpush.bf16.msra.mxu2 %v2424_v6  ;;  %v3427_v35 = vld [vmem:[%s5354_s2 + $0x1f4] sm:$0xf]  ;;  %v2593_v36 = vld [vmem:[%s5354_s2 + $0x1f8] sm:$0xf0]  ;;  %v2583_v41 = vld [vmem:[%s5354_s2 + $0x1e0] sm:$0xf]  ;;  %v2532_v48 = vor.u32 %v3411_v32, %v2529_v34  ;;  %v349_v53 = vpack.c.bf16 %v348_v40, %v347_v39 }
  0x1a   :  { %734 = vmatpush.bf16.msra.mxu3 %v2488_v10  ;;  %v3426_v44 = vld [vmem:[%s5354_s2 + $0x1e4] sm:$0xf0]  ;;  %v338_v45 = vld [vmem:[%s5353_s1] sm:$0xff]  ;;  %v341_v46 = vld [vmem:[%s5353_s1 + $0x18] sm:$0x3f]  ;;  %v2596_v52 = vor.u32 %v3427_v35, %v2593_v36 }
  0x1b   :  { %v3393_v49 = vld [vmem:[%s5354_s2 + $0xe4] sm:$0xf]  ;;  %v2457_v50 = vld [vmem:[%s5354_s2 + $0xe8] sm:$0xf0]  ;;  %v3936_v59 = vpack.c.bf16 %v341_v46, %v338_v45  ;;  %v2584_v60 = vor.u32 %v3426_v44, %v2583_v41  ;;  %v2575_v0 = vld [vmem:[%s5354_s2 + $0x1d0] sm:$0xf] }
  0x1c   :  { %441 = vmatpush.bf16.msra.mxu0 %v2352_v17  ;;  %v339_v51 = vld [vmem:[%s5353_s1 + $0x8] sm:$0xff]  ;;  %v3409_v54 = vld [vmem:[%s5354_s2 + $0x164] sm:$0xf]  ;;  %v2460_v62 = vor.u32 %v3393_v49, %v2457_v50  ;;  %v3424_v1 = vld [vmem:[%s5354_s2 + $0x1d4] sm:$0xf0] }
  0x1d   :  { %455 = vmatpush.bf16.msra.mxu1 %v2356_v21  ;;  %721 = vmatpush.bf16.msra.mxu2 %v2416_v22  ;;  %v2521_v55 = vld [vmem:[%s5354_s2 + $0x168] sm:$0xf0]  ;;  %v342_v56 = vld [vmem:[%s5353_s1 + $0x20] sm:$0x3f]  ;;  %v3391_v2 = vld [vmem:[%s5354_s2 + $0xd4] sm:$0xf]  ;;  %v2576_v9 = vor.u32 %v3424_v1, %v2575_v0 }
  0x1e   :  { %735 = vmatpush.bf16.msra.mxu3 %v2480_v26  ;;  %v3425_v57 = vld [vmem:[%s5354_s2 + $0x1e4] sm:$0xf]  ;;  %v2585_v58 = vld [vmem:[%s5354_s2 + $0x1e8] sm:$0xf0]  ;;  %v3938_v61 = vpack.c.bf16 %v342_v56, %v339_v51  ;;  %v2524_v63 = vor.u32 %v3409_v54, %v2521_v55  ;;  %v2449_v4 = vld [vmem:[%s5354_s2 + $0xd8] sm:$0xf0] }
  0x1f   :  { %v2588_v3 = vor.u32 %v3425_v57, %v2585_v58  ;;  %v3407_v5 = vld [vmem:[%s5354_s2 + $0x154] sm:$0xf]  ;;  %v2513_v6 = vld [vmem:[%s5354_s2 + $0x158] sm:$0xf0]  ;;  %v2452_v10 = vor.u32 %v3391_v2, %v2449_v4  ;;  %v2567_v12 = vld [vmem:[%s5354_s2 + $0x1c0] sm:$0xf] }
  0x20   :  { %442 = vmatpush.bf16.msra.mxu0 %v2344_v33  ;;  %v3423_v7 = vld [vmem:[%s5354_s2 + $0x1d4] sm:$0xf]  ;;  %v2577_v8 = vld [vmem:[%s5354_s2 + $0x1d8] sm:$0xf0]  ;;  %v2516_v11 = vor.u32 %v3407_v5, %v2513_v6  ;;  %v3422_v13 = vld [vmem:[%s5354_s2 + $0x1c4] sm:$0xf0] }
  0x21   :  { %456 = vmatpush.bf16.msra.mxu1 %v2348_v37  ;;  %722 = vmatpush.bf16.msra.mxu2 %v2408_v38  ;;  %v3389_v14 = vld [vmem:[%s5354_s2 + $0xc4] sm:$0xf]  ;;  %v2580_v15 = vor.u32 %v3423_v7, %v2577_v8  ;;  %v2441_v16 = vld [vmem:[%s5354_s2 + $0xc8] sm:$0xf0]  ;;  %v2568_v21 = vor.u32 %v3422_v13, %v2567_v12  ;;  %v2559_v24 = vld [vmem:[%s5354_s2 + $0x1b0] sm:$0xf] }
  0x22   :  { %736 = vmatpush.bf16.msra.mxu3 %v2472_v42  ;;  %v3405_v17 = vld [vmem:[%s5354_s2 + $0x144] sm:$0xf]  ;;  %v2505_v18 = vld [vmem:[%s5354_s2 + $0x148] sm:$0xf0]  ;;  %v2444_v22 = vor.u32 %v3389_v14, %v2441_v16  ;;  %v3420_v25 = vld [vmem:[%s5354_s2 + $0x1b4] sm:$0xf0] }
  0x23   :  { %443 = vmatmul.bf16.vlgmr.msra.gmra.mxu0 %v349_v53  ;;  %v3421_v19 = vld [vmem:[%s5354_s2 + $0x1c4] sm:$0xf]  ;;  %v2569_v20 = vld [vmem:[%s5354_s2 + $0x1c8] sm:$0xf0]  ;;  %v2508_v23 = vor.u32 %v3405_v17, %v2505_v18  ;;  %v3387_v26 = vld [vmem:[%s5354_s2 + $0xb4] sm:$0xf]  ;;  %v2560_v33 = vor.u32 %v3420_v25, %v2559_v24 }
  0x24   :  { %743 = vmatpush.bf16.msrb.mxu0 %v2592_v43  ;;  %457 = vmatmul.bf16.vlgmr.msra.gmra.mxu1 %v349_v53  ;;  %v2572_v27 = vor.u32 %v3421_v19, %v2569_v20  ;;  %v2433_v28 = vld [vmem:[%s5354_s2 + $0xb8] sm:$0xf0]  ;;  %v3403_v29 = vld [vmem:[%s5354_s2 + $0x134] sm:$0xf]  ;;  %v2551_v36 = vld [vmem:[%s5354_s2 + $0x1a0] sm:$0xf] }
  0x25   :  { %757 = vmatpush.bf16.msrb.mxu1 %v2468_v47  ;;  %771 = vmatpush.bf16.msrb.mxu2 %v2532_v48  ;;  %v2497_v30 = vld [vmem:[%s5354_s2 + $0x138] sm:$0xf0]  ;;  %v3419_v31 = vld [vmem:[%s5354_s2 + $0x1b4] sm:$0xf]  ;;  %v2436_v34 = vor.u32 %v3387_v26, %v2433_v28  ;;  %v3418_v37 = vld [vmem:[%s5354_s2 + $0x1a4] sm:$0xf0] }
  0x26   :  { %785 = vmatpush.bf16.msrb.mxu3 %v2596_v52  ;;  %723 = vmatmul.bf16.vlgmr.msra.gmra.mxu2 %v3936_v59  ;;  %v2561_v32 = vld [vmem:[%s5354_s2 + $0x1b8] sm:$0xf0]  ;;  %v2500_v35 = vor.u32 %v3403_v29, %v2497_v30  ;;  %v3385_v38 = vld [vmem:[%s5354_s2 + $0xa4] sm:$0xf]  ;;  %v2425_v40 = vld [vmem:[%s5354_s2 + $0xa8] sm:$0xf0]  ;;  %v2552_v45 = vor.u32 %v3418_v37, %v2551_v36 }
  0x27   :  { %737 = vmatmul.bf16.vlgmr.msra.gmra.mxu3 %v3938_v61  ;;  %v2564_v39 = vor.u32 %v3419_v31, %v2561_v32  ;;  %v3401_v41 = vld [vmem:[%s5354_s2 + $0x124] sm:$0xf]  ;;  %v2489_v42 = vld [vmem:[%s5354_s2 + $0x128] sm:$0xf0]  ;;  %v2428_v46 = vor.u32 %v3385_v38, %v2425_v40  ;;  %v2543_v48 = vld [vmem:[%s5354_s2 + $0x190] sm:$0xf] }
  0x28   :  { %744 = vmatpush.bf16.msrb.mxu0 %v2584_v60  ;;  %v3417_v43 = vld [vmem:[%s5354_s2 + $0x1a4] sm:$0xf]  ;;  %v2553_v44 = vld [vmem:[%s5354_s2 + $0x1a8] sm:$0xf0]  ;;  %v2492_v47 = vor.u32 %v3401_v41, %v2489_v42  ;;  %v3416_v49 = vld [vmem:[%s5354_s2 + $0x194] sm:$0xf0] }
  0x29   :  { %758 = vmatpush.bf16.msrb.mxu1 %v2460_v62  ;;  %772 = vmatpush.bf16.msrb.mxu2 %v2524_v63  ;;  %v3383_v50 = vld [vmem:[%s5354_s2 + $0x94] sm:$0xf]  ;;  %v2556_v51 = vor.u32 %v3417_v43, %v2553_v44  ;;  %v2417_v52 = vld [vmem:[%s5354_s2 + $0x98] sm:$0xf0]  ;;  %v2544_v57 = vor.u32 %v3416_v49, %v2543_v48  ;;  %v2535_v58 = vld [vmem:[%s5354_s2 + $0x180] sm:$0xf] }
  0x2a   :  { %786 = vmatpush.bf16.msrb.mxu3 %v2588_v3  ;;  %v3399_v53 = vld [vmem:[%s5354_s2 + $0x114] sm:$0xf]  ;;  %v2481_v54 = vld [vmem:[%s5354_s2 + $0x118] sm:$0xf0]  ;;  %v3414_v60 = vld [vmem:[%s5354_s2 + $0x184] sm:$0xf0]  ;;  %v2420_v63 = vor.u32 %v3383_v50, %v2417_v52 }
  0x2b   :  { %v3415_v55 = vld [vmem:[%s5354_s2 + $0x194] sm:$0xf]  ;;  %v2545_v56 = vld [vmem:[%s5354_s2 + $0x198] sm:$0xf0]  ;;  %v3381_v62 = vld [vmem:[%s5354_s2 + $0x84] sm:$0xf]  ;;  %v2484_v0 = vor.u32 %v3399_v53, %v2481_v54 }
  0x2c   :  { %745 = vmatpush.bf16.msrb.mxu0 %v2576_v9  ;;  %v2409_v1 = vld [vmem:[%s5354_s2 + $0x88] sm:$0xf0]  ;;  %v3397_v2 = vld [vmem:[%s5354_s2 + $0x104] sm:$0xf] }
  0x2d   :  { %759 = vmatpush.bf16.msrb.mxu1 %v2452_v10  ;;  %773 = vmatpush.bf16.msrb.mxu2 %v2516_v11 }
  0x2e   :  { %787 = vmatpush.bf16.msrb.mxu3 %v2580_v15 }
  0x30   :  { %746 = vmatpush.bf16.msrb.mxu0 %v2568_v21 }
  0x31   :  { %760 = vmatpush.bf16.msrb.mxu1 %v2444_v22  ;;  %774 = vmatpush.bf16.msrb.mxu2 %v2508_v23 }
  0x32   :  { %788 = vmatpush.bf16.msrb.mxu3 %v2572_v27 }
  0x34   :  { %747 = vmatpush.bf16.msrb.mxu0 %v2560_v33 }
  0x35   :  { %761 = vmatpush.bf16.msrb.mxu1 %v2436_v34  ;;  %775 = vmatpush.bf16.msrb.mxu2 %v2500_v35 }
  0x36   :  { %789 = vmatpush.bf16.msrb.mxu3 %v2564_v39 }
  0x38   :  { %748 = vmatpush.bf16.msrb.mxu0 %v2552_v45 }
  0x39   :  { %762 = vmatpush.bf16.msrb.mxu1 %v2428_v46  ;;  %776 = vmatpush.bf16.msrb.mxu2 %v2492_v47 }
  0x3a   :  { %12 = vsyncpa [#allocation3], 0  ;;  %790 = vmatpush.bf16.msrb.mxu3 %v2556_v51  ;;  %v2548_v3 = vor.u32 %v3415_v55, %v2545_v56  ;;  %v2473_v4 = vld [vmem:[%s5354_s2 + $0x108] sm:$0xf0]  ;;  %v3413_v5 = vld [vmem:[%s5354_s2 + $0x184] sm:$0xf]  ;;  %v2536_v10 = vor.u32 %v3414_v60, %v2535_v58  ;;  %v2412_v14 = vor.u32 %v3381_v62, %v2409_v1 }
  0x3b   :  { %v2537_v6 = vld [vmem:[%s5354_s2 + $0x188] sm:$0xf0]  ;;  %v340_v7 = vld [vmem:[%s5353_s1 + $0x10] sm:$0xff]  ;;  %v2683_v8 = vld [vmem:[%s5355_s3 + $0xa8] sm:$0xf]  ;;  %v2476_v15 = vor.u32 %v3397_v2, %v2473_v4  ;;  %vm827_vm0 = vcmask 1040384  }
  0x3c   :  { %v3499_v9 = vld [vmem:[%s5355_s3 + $0xb0] sm:$0xf0]  ;;  %749 = vmatpush.bf16.msrb.mxu0 %v2544_v57  ;;  %v343_v11 = vld [vmem:[%s5353_s1 + $0x28] sm:$0x3f]  ;;  %v2540_v16 = vor.u32 %v3413_v5, %v2537_v6  ;;  %v2671_v20 = vld [vmem:[%s5355_s3 + $0x90] sm:$0xf] }
  0x3d   :  { %v2779_v12 = vld [vmem:[%s5355_s3 + $0x168] sm:$0xf]  ;;  %v3523_v13 = vld [vmem:[%s5355_s3 + $0x170] sm:$0xf0]  ;;  %763 = vmatpush.bf16.msrb.mxu1 %v2420_v63  ;;  %777 = vmatpush.bf16.msrb.mxu2 %v2484_v0  ;;  %v2684_v17 = vor.u32 %v3499_v9, %v2683_v8  ;;  %v469_v18 = vpack.c.bf16 %v343_v11, %v340_v7  ;;  %v3496_v21 = vld [vmem:[%s5355_s3 + $0x98] sm:$0xf0] }
  0x3e   :  { %791 = vmatpush.bf16.msrb.mxu3 %v2548_v3  ;;  %v2780_v19 = vor.u32 %v3523_v13, %v2779_v12  ;;  %v2767_v22 = vld [vmem:[%s5355_s3 + $0x150] sm:$0xf]  ;;  %v3520_v23 = vld [vmem:[%s5355_s3 + $0x158] sm:$0xf0]  ;;  %v2672_v24 = vor.u32 %v3496_v21, %v2671_v20  ;;  %v2659_v26 = vld [vmem:[%s5355_s3 + $0x78] sm:$0xf] }
  0x3f   :  { %v2768_v25 = vor.u32 %v3520_v23, %v2767_v22  ;;  %v3493_v27 = vld [vmem:[%s5355_s3 + $0x80] sm:$0xf0]  ;;  %v2755_v28 = vld [vmem:[%s5355_s3 + $0x138] sm:$0xf]  ;;  %v2647_v32 = vld [vmem:[%s5355_s3 + $0x60] sm:$0xf] }
  0x40   :  { %750 = vmatpush.bf16.msrb.mxu0 %v2536_v10  ;;  %v3517_v29 = vld [vmem:[%s5355_s3 + $0x140] sm:$0xf0]  ;;  %v2660_v30 = vor.u32 %v3493_v27, %v2659_v26  ;;  %v3514_v33 = vld [vmem:[%s5355_s3 + $0x128] sm:$0xf0]  ;;  %v2635_v36 = vld [vmem:[%s5355_s3 + $0x48] sm:$0xf] }
  0x41   :  { %764 = vmatpush.bf16.msrb.mxu1 %v2412_v14  ;;  %778 = vmatpush.bf16.msrb.mxu2 %v2476_v15  ;;  %v2756_v31 = vor.u32 %v3517_v29, %v2755_v28  ;;  %v3487_v37 = vld [vmem:[%s5355_s3 + $0x50] sm:$0xf0]  ;;  %v2731_v38 = vld [vmem:[%s5355_s3 + $0x108] sm:$0xf]  ;;  %v2623_v42 = vld [vmem:[%s5355_s3 + $0x30] sm:$0xf] }
  0x42   :  { %792 = vmatpush.bf16.msrb.mxu3 %v2540_v16  ;;  %v3511_v39 = vld [vmem:[%s5355_s3 + $0x110] sm:$0xf0]  ;;  %v2636_v40 = vor.u32 %v3487_v37, %v2635_v36  ;;  %v3484_v43 = vld [vmem:[%s5355_s3 + $0x38] sm:$0xf0]  ;;  %v2719_v44 = vld [vmem:[%s5355_s3 + $0xf0] sm:$0xf] }
  0x43   :  { %751 = vmatmul.bf16.vlgmr.msrb.gmra.mxu0 %v469_v18  ;;  %v2732_v41 = vor.u32 %v3511_v39, %v2731_v38  ;;  %v3508_v45 = vld [vmem:[%s5355_s3 + $0xf8] sm:$0xf0]  ;;  %v2624_v46 = vor.u32 %v3484_v43, %v2623_v42  ;;  %v2611_v48 = vld [vmem:[%s5355_s3 + $0x18] sm:$0xf]  ;;  %v3481_v49 = vld [vmem:[%s5355_s3 + $0x20] sm:$0xf0] }
  0x44   :  { %1400 = vmatpush.bf16.msra.mxu0 %v2684_v17  ;;  %765 = vmatmul.bf16.vlgmr.msrb.gmra.mxu1 %v3936_v59  ;;  %v3490_v59 = vld [vmem:[%s5355_s3 + $0x68] sm:$0xf0]  ;;  %v2720_v47 = vor.u32 %v3508_v45, %v2719_v44  ;;  %v2707_v50 = vld [vmem:[%s5355_s3 + $0xd8] sm:$0xf]  ;;  %v3505_v51 = vld [vmem:[%s5355_s3 + $0xe0] sm:$0xf0]  ;;  %v2612_v52 = vor.u32 %v3481_v49, %v2611_v48 }
  0x45   :  { %1413 = vmatpush.bf16.msra.mxu1 %v2780_v19  ;;  %779 = vmatmul.bf16.vlgmr.msrb.gmra.mxu2 %v3938_v61  ;;  %v2743_v61 = vld [vmem:[%s5355_s3 + $0x120] sm:$0xf]  ;;  %v2648_v34 = vor.u32 %v3490_v59, %v2647_v32  ;;  %v2708_v53 = vor.u32 %v3505_v51, %v2707_v50  ;;  %v3478_v55 = vld [vmem:[%s5355_s3 + $0x8] sm:$0xf0]  ;;  %v2685_v62 = vld [vmem:[%s5355_s3 + $0xb4] sm:$0xf0] }
  0x46   :  { %793 = vmatmul.bf16.vlgmr.msrb.gmra.mxu3 %v469_v18  ;;  %v2744_v35 = vor.u32 %v3514_v33, %v2743_v61  ;;  %v2599_v54 = vld [vmem:[%s5355_s3] sm:$0xf]  ;;  %v3502_v58 = vld [vmem:[%s5355_s3 + $0xc8] sm:$0xf0]  ;;  %v2781_v2 = vld [vmem:[%s5355_s3 + $0x174] sm:$0xf0] }
  0x47   :  { %v2695_v56 = vld [vmem:[%s5355_s3 + $0xc0] sm:$0xf]  ;;  %v2600_v57 = vor.u32 %v3478_v55, %v2599_v54  ;;  %v3498_v60 = vld [vmem:[%s5355_s3 + $0xac] sm:$0xf]  ;;  %v2875_v4 = vld [vmem:[%s5355_s3 + $0x228] sm:$0xf] }
  0x48   :  { %1401 = vmatpush.bf16.msra.mxu0 %v2672_v24  ;;  %v2696_v63 = vor.u32 %v3502_v58, %v2695_v56  ;;  %v2688_v0 = vor.u32 %v3498_v60, %v2685_v62  ;;  %v3522_v1 = vld [vmem:[%s5355_s3 + $0x16c] sm:$0xf]  ;;  %v3547_v5 = vld [vmem:[%s5355_s3 + $0x230] sm:$0xf0]  ;;  %v2673_v8 = vld [vmem:[%s5355_s3 + $0x9c] sm:$0xf0] }
  0x49   :  { %1414 = vmatpush.bf16.msra.mxu1 %v2768_v25  ;;  %v2784_v3 = vor.u32 %v3522_v1, %v2781_v2  ;;  %v3495_v6 = vld [vmem:[%s5355_s3 + $0x94] sm:$0xf]  ;;  %v2876_v7 = vor.u32 %v3547_v5, %v2875_v4  ;;  %v2769_v10 = vld [vmem:[%s5355_s3 + $0x15c] sm:$0xf0]  ;;  %v2863_v13 = vld [vmem:[%s5355_s3 + $0x210] sm:$0xf] }
  0x4a   :  { %v3519_v9 = vld [vmem:[%s5355_s3 + $0x154] sm:$0xf]  ;;  %v2676_v11 = vor.u32 %v3495_v6, %v2673_v8  ;;  %v3544_v14 = vld [vmem:[%s5355_s3 + $0x218] sm:$0xf0]  ;;  %v2661_v17 = vld [vmem:[%s5355_s3 + $0x84] sm:$0xf0] }
  0x4b   :  { %v2772_v12 = vor.u32 %v3519_v9, %v2769_v10  ;;  %1426 = vmatpush.bf16.msra.mxu2 %v2876_v7  ;;  %v2864_v15 = vor.u32 %v3544_v14, %v2863_v13  ;;  %v3492_v16 = vld [vmem:[%s5355_s3 + $0x7c] sm:$0xf]  ;;  %v2757_v20 = vld [vmem:[%s5355_s3 + $0x144] sm:$0xf0]  ;;  %v2851_v22 = vld [vmem:[%s5355_s3 + $0x1f8] sm:$0xf] }
  0x4c   :  { %1402 = vmatpush.bf16.msra.mxu0 %v2660_v30  ;;  %v3516_v18 = vld [vmem:[%s5355_s3 + $0x13c] sm:$0xf]  ;;  %v2664_v19 = vor.u32 %v3492_v16, %v2661_v17  ;;  %v3541_v23 = vld [vmem:[%s5355_s3 + $0x200] sm:$0xf0]  ;;  %v2971_v24 = vld [vmem:[%s5355_s3 + $0x2e8] sm:$0xf] }
  0x4d   :  { %1415 = vmatpush.bf16.msra.mxu1 %v2756_v31  ;;  %v2760_v21 = vor.u32 %v3516_v18, %v2757_v20  ;;  %v2852_v25 = vor.u32 %v3541_v23, %v2851_v22  ;;  %v3571_v26 = vld [vmem:[%s5355_s3 + $0x2f0] sm:$0xf0]  ;;  %v3489_v27 = vld [vmem:[%s5355_s3 + $0x64] sm:$0xf]  ;;  %v2649_v28 = vld [vmem:[%s5355_s3 + $0x6c] sm:$0xf0] }
  0x4e   :  { %v2972_v29 = vor.u32 %v3571_v26, %v2971_v24  ;;  %v2652_v30 = vor.u32 %v3489_v27, %v2649_v28  ;;  %v3513_v31 = vld [vmem:[%s5355_s3 + $0x124] sm:$0xf]  ;;  %v2745_v32 = vld [vmem:[%s5355_s3 + $0x12c] sm:$0xf0]  ;;  %v2839_v61 = vld [vmem:[%s5355_s3 + $0x1e0] sm:$0xf] }
  0x4f   :  { %1427 = vmatpush.bf16.msra.mxu2 %v2864_v15  ;;  %v2748_v59 = vor.u32 %v3513_v31, %v2745_v32  ;;  %v3538_v33 = vld [vmem:[%s5355_s3 + $0x1e8] sm:$0xf0]  ;;  %v3568_v36 = vld [vmem:[%s5355_s3 + $0x2d8] sm:$0xf0]  ;;  %v2637_v38 = vld [vmem:[%s5355_s3 + $0x54] sm:$0xf0] }
  0x50   :  { %1403 = vmatpush.bf16.msra.mxu0 %v2648_v34  ;;  %1439 = vmatpush.bf16.msra.mxu3 %v2972_v29  ;;  %v2959_v34 = vld [vmem:[%s5355_s3 + $0x2d0] sm:$0xf]  ;;  %v3486_v37 = vld [vmem:[%s5355_s3 + $0x4c] sm:$0xf]  ;;  %v2733_v42 = vld [vmem:[%s5355_s3 + $0x114] sm:$0xf0] }
  0x51   :  { %1416 = vmatpush.bf16.msra.mxu1 %v2744_v35  ;;  %v2840_v35 = vor.u32 %v3538_v33, %v2839_v61  ;;  %v2960_v39 = vor.u32 %v3568_v36, %v2959_v34  ;;  %v2827_v44 = vld [vmem:[%s5355_s3 + $0x1c8] sm:$0xf]  ;;  %v3535_v45 = vld [vmem:[%s5355_s3 + $0x1d0] sm:$0xf0]  ;;  %v3565_v48 = vld [vmem:[%s5355_s3 + $0x2c0] sm:$0xf0] }
  0x52   :  { %v3483_v49 = vld [vmem:[%s5355_s3 + $0x34] sm:$0xf]  ;;  %v2625_v50 = vld [vmem:[%s5355_s3 + $0x3c] sm:$0xf0]  ;;  %v3532_v58 = vld [vmem:[%s5355_s3 + $0x1b8] sm:$0xf0] }
  0x53   :  { %1428 = vmatpush.bf16.msra.mxu2 %v2852_v25  ;;  %v4307_v51 = vld [vmem:[%s5356_s4] ss:$8 sm:$0x3]  ;;  %v3507_v54 = vld [vmem:[%s5355_s3 + $0xf4] sm:$0xf]  ;;  %vm832_vm1 = vcmask 1046528  }
  0x54   :  { %1404 = vmatpush.bf16.msra.mxu0 %v2636_v40  ;;  %v2640_v40 = vor.u32 %v3486_v37, %v2637_v38  ;;  %1440 = vmatpush.bf16.msra.mxu3 %v2960_v39  ;;  %v2721_v55 = vld [vmem:[%s5355_s3 + $0xfc] sm:$0xf0]  ;;  %v2613_v1 = vld [vmem:[%s5355_s3 + $0x24] sm:$0xf0]  ;;  %v3504_v4 = vld [vmem:[%s5355_s3 + $0xdc] sm:$0xf] }
  0x55   :  { %1417 = vmatpush.bf16.msra.mxu1 %v2732_v41  ;;  %v3510_v41 = vld [vmem:[%s5355_s3 + $0x10c] sm:$0xf]  ;;  %v2724_v56 = vor.u32 %v3507_v54, %v2721_v55  ;;  %v2935_v60 = vld [vmem:[%s5355_s3 + $0x2a0] sm:$0xf]  ;;  %v2709_v5 = vld [vmem:[%s5355_s3 + $0xe4] sm:$0xf0] }
  0x56   :  { %v2736_v43 = vor.u32 %v3510_v41, %v2733_v42  ;;  %v2712_v6 = vor.u32 %v3504_v4, %v2709_v5  ;;  %v351_v7 = vperm.slane %v4307_v51, 0  ;;  %v352_v8 = vperm.slane %v4307_v51, 1  ;;  %v2803_v9 = vld [vmem:[%s5355_s3 + $0x198] sm:$0xf]  ;;  %v3529_v10 = vld [vmem:[%s5355_s3 + $0x1a0] sm:$0xf0] }
  0x57   :  { %1429 = vmatpush.bf16.msra.mxu2 %v2840_v35  ;;  %v3559_v13 = vld [vmem:[%s5355_s3 + $0x290] sm:$0xf0]  ;;  %v3477_v14 = vld [vmem:[%s5355_s3 + $0x4] sm:$0xf]  ;;  %v2601_v15 = vld [vmem:[%s5355_s3 + $0xc] sm:$0xf0] }
  0x58   :  { %1405 = vmatpush.bf16.msra.mxu0 %v2624_v46  ;;  %v2947_v46 = vld [vmem:[%s5355_s3 + $0x2b8] sm:$0xf]  ;;  %v2604_v17 = vor.u32 %v3477_v14, %v2601_v15  ;;  %v3501_v18 = vld [vmem:[%s5355_s3 + $0xc4] sm:$0xf]  ;;  %v2791_v24 = vld [vmem:[%s5355_s3 + $0x180] sm:$0xf] }
  0x59   :  { %1418 = vmatpush.bf16.msra.mxu1 %v2720_v47  ;;  %v2828_v47 = vor.u32 %v3535_v45, %v2827_v44  ;;  %v3526_v25 = vld [vmem:[%s5355_s3 + $0x188] sm:$0xf0]  ;;  %v2911_v28 = vld [vmem:[%s5355_s3 + $0x270] sm:$0xf]  ;;  %v3556_v29 = vld [vmem:[%s5355_s3 + $0x278] sm:$0xf0] }
  0x5a   :  { %v2792_v27 = vor.u32 %v3526_v25, %v2791_v24  ;;  %v2912_v31 = vor.u32 %v3556_v29, %v2911_v28  ;;  %v3546_v32 = vld [vmem:[%s5355_s3 + $0x22c] sm:$0xf]  ;;  %v2899_v36 = vld [vmem:[%s5355_s3 + $0x258] sm:$0xf]  ;;  %v3553_v37 = vld [vmem:[%s5355_s3 + $0x260] sm:$0xf0] }
  0x5b   :  { %1430 = vmatpush.bf16.msra.mxu2 %v2828_v47  ;;  %v2900_v39 = vor.u32 %v3553_v37, %v2899_v36  ;;  %v2865_v41 = vld [vmem:[%s5355_s3 + $0x21c] sm:$0xf0]  ;;  %v2853_v54 = vld [vmem:[%s5355_s3 + $0x204] sm:$0xf0]  ;;  %v2841_v4 = vld [vmem:[%s5355_s3 + $0x1ec] sm:$0xf0] }
  0x5c   :  { %1406 = vmatpush.bf16.msra.mxu0 %v2612_v52  ;;  %v2948_v52 = vor.u32 %v3565_v48, %v2947_v46  ;;  %v2887_v48 = vld [vmem:[%s5355_s3 + $0x240] sm:$0xf]  ;;  %v2691_v37 = vld [vmem:[%s5355_s3 + $0xb0] sm:$0xf]  ;;  %vm2232_vm2 = vcmask 1041408   ;;  %vm2234_vm3 = vcmask 1043456  }
  0x5d   :  { %1419 = vmatpush.bf16.msra.mxu1 %v2708_v53  ;;  %v2628_v53 = vor.u32 %v3483_v49, %v2625_v50  ;;  %v3550_v49 = vld [vmem:[%s5355_s3 + $0x248] sm:$0xf0]  ;;  %s2324_s9 = sshll.u32 %s5358_s6, 4  ;;  %s3642_s12 = smov [#allocation2]   ;;  %s2325_s9 = int_to_ptr.hbm [resolvable:$true] %s2324_s9 }
  0x5e   :  { %1441 = vmatpush.bf16.msra.mxu3 %v2948_v52  ;;  %v2888_v52 = vor.u32 %v3550_v49, %v2887_v48 }
  0x60   :  { %1407 = vmatpush.bf16.msra.mxu0 %v2600_v57  ;;  %v2815_v57 = vld [vmem:[%s5355_s3 + $0x1b0] sm:$0xf] }
  0x61   :  { %1420 = vmatpush.bf16.msra.mxu1 %v2696_v63  ;;  %v2816_v62 = vor.u32 %v3532_v58, %v2815_v57  ;;  %v3562_v63 = vld [vmem:[%s5355_s3 + $0x2a8] sm:$0xf0]  ;;  %v2973_v58 = vld [vmem:[%s5355_s3 + $0x2f4] sm:$0xf0] }
  0x62   :  { %v2936_v2 = vor.u32 %v3562_v63, %v2935_v60  ;;  %v3570_v57 = vld [vmem:[%s5355_s3 + $0x2ec] sm:$0xf] }
  0x63   :  { %1431 = vmatpush.bf16.msra.mxu2 %v2816_v62  ;;  %v2976_v62 = vor.u32 %v3570_v57, %v2973_v58  ;;  %v3497_v57 = vld [vmem:[%s5355_s3 + $0xa0] sm:$0xf0] }
  0x64   :  { %1452 = vmatpush.bf16.msrb.mxu0 %v2688_v0  ;;  %v3480_v0 = vld [vmem:[%s5355_s3 + $0x1c] sm:$0xf]  ;;  %1442 = vmatpush.bf16.msra.mxu3 %v2936_v2 }
  0x65   :  { %1465 = vmatpush.bf16.msrb.mxu1 %v2784_v3  ;;  %v2616_v3 = vor.u32 %v3480_v0, %v2613_v1 }
  0x68   :  { %1453 = vmatpush.bf16.msrb.mxu0 %v2676_v11  ;;  %v2923_v11 = vld [vmem:[%s5355_s3 + $0x288] sm:$0xf] }
  0x69   :  { %1466 = vmatpush.bf16.msrb.mxu1 %v2772_v12  ;;  %v2804_v12 = vor.u32 %v3529_v10, %v2803_v9  ;;  %v2924_v16 = vor.u32 %v3559_v13, %v2923_v11  ;;  %v4428_v13 = vld [vmem:[%s5356_s4 + $0x1] ss:$8 sm:$0x3] }
  0x6a   :  { %v471_v25 = vperm.slane %v4428_v13, 0 }
  0x6b   :  { %1432 = vmatpush.bf16.msra.mxu2 %v2804_v12  ;;  %1443 = vmatpush.bf16.msra.mxu3 %v2924_v16 }
  0x6c   :  { %1454 = vmatpush.bf16.msrb.mxu0 %v2664_v19  ;;  %v2697_v19 = vld [vmem:[%s5355_s3 + $0xcc] sm:$0xf0] }
  0x6d   :  { %1467 = vmatpush.bf16.msrb.mxu1 %v2760_v21  ;;  %v2700_v21 = vor.u32 %v3501_v18, %v2697_v19  ;;  %v2829_v18 = vld [vmem:[%s5355_s3 + $0x1d4] sm:$0xf0] }
  0x6f   :  { %1433 = vmatpush.bf16.msra.mxu2 %v2792_v27  ;;  %1444 = vmatpush.bf16.msra.mxu3 %v2912_v31  ;;  %v3531_v31 = vld [vmem:[%s5355_s3 + $0x1b4] sm:$0xf] }
  0x70   :  { %1455 = vmatpush.bf16.msrb.mxu0 %v2652_v30 }
  0x71   :  { %1468 = vmatpush.bf16.msrb.mxu1 %v2748_v59  ;;  %v2877_v59 = vld [vmem:[%s5355_s3 + $0x234] sm:$0xf0] }
  0x72   :  { %v2880_v33 = vor.u32 %v3546_v32, %v2877_v59  ;;  %v2817_v32 = vld [vmem:[%s5355_s3 + $0x1bc] sm:$0xf0] }
  0x73   :  { %1445 = vmatpush.bf16.msra.mxu3 %v2900_v39 }
  0x74   :  { %1456 = vmatpush.bf16.msrb.mxu0 %v2640_v40  ;;  %1478 = vmatpush.bf16.msrb.mxu2 %v2880_v33  ;;  %v3543_v40 = vld [vmem:[%s5355_s3 + $0x214] sm:$0xf]  ;;  %v3561_v33 = vld [vmem:[%s5355_s3 + $0x2a4] sm:$0xf] }
  0x75   :  { %1469 = vmatpush.bf16.msrb.mxu1 %v2736_v43  ;;  %v2868_v44 = vor.u32 %v3543_v40, %v2865_v41  ;;  %v2787_v41 = vld [vmem:[%s5355_s3 + $0x170] sm:$0xf] }
  0x77   :  { %1446 = vmatpush.bf16.msra.mxu3 %v2888_v52 }
  0x78   :  { %1457 = vmatpush.bf16.msrb.mxu0 %v2628_v53  ;;  %1479 = vmatpush.bf16.msrb.mxu2 %v2868_v44  ;;  %v3540_v53 = vld [vmem:[%s5355_s3 + $0x1fc] sm:$0xf] }
  0x79   :  { %1470 = vmatpush.bf16.msrb.mxu1 %v2724_v56  ;;  %v2856_v56 = vor.u32 %v3540_v53, %v2853_v54 }
  0x7b   :  { %1491 = vmatpush.bf16.msrb.mxu3 %v2976_v62 }
  0x7c   :  { %1458 = vmatpush.bf16.msrb.mxu0 %v2616_v3  ;;  %1480 = vmatpush.bf16.msrb.mxu2 %v2856_v56  ;;  %v3537_v3 = vld [vmem:[%s5355_s3 + $0x1e4] sm:$0xf]  ;;  %v2679_v56 = vld [vmem:[%s5355_s3 + $0x98] sm:$0xf] }
  0x7d   :  { %1471 = vmatpush.bf16.msrb.mxu1 %v2712_v6  ;;  %v2844_v6 = vor.u32 %v3537_v3, %v2841_v4 }
  0x80   :  { %1459 = vmatpush.bf16.msrb.mxu0 %v2604_v17  ;;  %1481 = vmatpush.bf16.msrb.mxu2 %v2844_v6  ;;  %v3534_v17 = vld [vmem:[%s5355_s3 + $0x1cc] sm:$0xf]  ;;  %v2793_v6 = vld [vmem:[%s5355_s3 + $0x18c] sm:$0xf0] }
  0x81   :  { %1472 = vmatpush.bf16.msrb.mxu1 %v2700_v21  ;;  %v2832_v21 = vor.u32 %v3534_v17, %v2829_v18  ;;  %v2763_v17 = vld [vmem:[%s5355_s3 + $0x140] sm:$0xf] }
  0x84   :  { %1482 = vmatpush.bf16.msrb.mxu2 %v2832_v21  ;;  %v3552_v21 = vld [vmem:[%s5355_s3 + $0x25c] sm:$0xf] }
  0xa0   :  { %v444_v20 = vpop.f32.mrf.mxu0 }
  0xa1   :  { %v445_v22 = vadd.f32 %v444_v20, %v351_v7  ;;  %v458_v23 = vpop.f32.mrf.mxu1 }
  0xa2   :  { %v459_v26 = vadd.f32 %v458_v23, %v352_v8  ;;  %v2949_v23 = vld [vmem:[%s5355_s3 + $0x2c4] sm:$0xf0] }
  0xa3   :  { %v463_v30 = vmax.f32 %v445_v22, 0.0  ;;  %v3564_v22 = vld [vmem:[%s5355_s3 + $0x2bc] sm:$0xf] }
  0xa4   :  { %v464_v61 = vmax.f32 %v459_v26, 0.0  ;;  %v2952_v26 = vor.u32 %v3564_v22, %v2949_v23  ;;  %v2901_v22 = vld [vmem:[%s5355_s3 + $0x264] sm:$0xf0] }
  0xa5   :  { %v803_v34 = vrot.slane %v463_v30, 4 }
  0xa6   :  { %v809_v35 = vrot.slane %v464_v61, 4 }
  0xa7   :  { %v804_v38 = vadd.f32 %v803_v34, %v463_v30  ;;  %v2937_v34 = vld [vmem:[%s5355_s3 + $0x2ac] sm:$0xf0] }
  0xa8   :  { %v810_v42 = vadd.f32 %v809_v35, %v464_v61  ;;  %v446_v43 = vpop.f32.mrf.mxu0  ;;  %v2820_v61 = vor.u32 %v3531_v31, %v2817_v32  ;;  %v2940_v39 = vor.u32 %v3561_v33, %v2937_v34  ;;  %v2904_v31 = vor.u32 %v3552_v21, %v2901_v22  ;;  %v2751_v33 = vld [vmem:[%s5355_s3 + $0x128] sm:$0xf]  ;;  %v3515_v34 = vld [vmem:[%s5355_s3 + $0x130] sm:$0xf0] }
  0xa9   :  { %v805_v45 = vrot.slane %v804_v38, 2  ;;  %v447_v46 = vadd.f32 %v446_v43, %v351_v7  ;;  %v460_v47 = vpop.f32.mrf.mxu1  ;;  %v3567_v7 = vld [vmem:[%s5355_s3 + $0x2d4] sm:$0xf]  ;;  %v724_v16 = vpop.f32.mrf.mxu2 }
  0xaa   :  { %v811_v50 = vrot.slane %v810_v42, 2  ;;  %v461_v51 = vadd.f32 %v460_v47, %v352_v8  ;;  %v2961_v8 = vld [vmem:[%s5355_s3 + $0x2dc] sm:$0xf0]  ;;  %v738_v20 = vpop.f32.mrf.mxu3  ;;  %v725_v36 = vadd.f32 %v724_v16, %v471_v25  ;;  %1483 = vmatpush.bf16.msrb.mxu2 %v2820_v61  ;;  %v3494_v16 = vld [vmem:[%s5355_s3 + $0x88] sm:$0xf0] }
  0xab   :  { %v465_v55 = vmax.f32 %v447_v46, 0.0  ;;  %v806_v63 = vadd.f32 %v805_v45, %v804_v38  ;;  %v2964_v10 = vor.u32 %v3567_v7, %v2961_v8  ;;  %v3500_v38 = vld [vmem:[%s5355_s3 + $0xb8] sm:$0xf0]  ;;  %v2805_v46 = vld [vmem:[%s5355_s3 + $0x1a4] sm:$0xf0]  ;;  %v2680_v8 = vor.u32 %v3497_v57, %v2679_v56 }
  0xac   :  { %v466_v60 = vmax.f32 %v461_v51, 0.0  ;;  %v812_v1 = vadd.f32 %v811_v50, %v810_v42  ;;  %v3524_v42 = vld [vmem:[%s5355_s3 + $0x178] sm:$0xf0]  ;;  %v2692_v48 = vor.u32 %v3500_v38, %v2691_v37  ;;  %v3558_v50 = vld [vmem:[%s5355_s3 + $0x28c] sm:$0xf]  ;;  %v739_v52 = vadd.f32 %v738_v20, %v725_v36 }
  0xad   :  { %v815_v0 = vrot.slane %v465_v55, 4  ;;  %v807_v11 = vrot.slane %v806_v63, 1  ;;  %1492 = vmatpush.bf16.msrb.mxu3 %v2964_v10  ;;  %v3528_v45 = vld [vmem:[%s5355_s3 + $0x19c] sm:$0xf]  ;;  %v2925_v51 = vld [vmem:[%s5355_s3 + $0x294] sm:$0xf0] }
  0xae   :  { %v821_v2 = vrot.slane %v466_v60, 4  ;;  %v813_v14 = vrot.slane %v812_v1, 1  ;;  %v2808_v49 = vor.u32 %v3528_v45, %v2805_v46  ;;  %v2928_v58 = vor.u32 %v3558_v50, %v2925_v51  ;;  %v3555_v7 = vld [vmem:[%s5355_s3 + $0x274] sm:$0xf]  ;;  %v3518_v20 = vld [vmem:[%s5355_s3 + $0x148] sm:$0xf0] }
  0xaf   :  { %v816_v5 = vadd.f32 %v815_v0, %v465_v55  ;;  %v808_v27 = vadd.f32 %v807_v11, %v806_v63  ;;  %v2788_v55 = vor.u32 %v3524_v42, %v2787_v41  ;;  %v472_v63 = vperm.slane %v4428_v13, 1  ;;  %v2913_v11 = vld [vmem:[%s5355_s3 + $0x27c] sm:$0xf0]  ;;  %v3549_v36 = vld [vmem:[%s5355_s3 + $0x244] sm:$0xf] }
  0xb0   :  { %v822_v9 = vadd.f32 %v821_v2, %v466_v60  ;;  %v814_v29 = vadd.f32 %v813_v14, %v812_v1  ;;  %v2775_v1 = vld [vmem:[%s5355_s3 + $0x158] sm:$0xf]  ;;  %v3521_v2 = vld [vmem:[%s5355_s3 + $0x160] sm:$0xf0]  ;;  %1484 = vmatpush.bf16.msrb.mxu2 %v2808_v49  ;;  %v2916_v18 = vor.u32 %v3555_v7, %v2913_v11  ;;  %v2889_v37 = vld [vmem:[%s5355_s3 + $0x24c] sm:$0xf0] }
  0xb1   :  { %v817_v12 = vrot.slane %v816_v5, 2  ;;  %1493 = vmatpush.bf16.msrb.mxu3 %v2952_v26  ;;  %v726_v53 = vpop.f32.mrf.mxu2  ;;  %v3488_v45 = vld [vmem:[%s5355_s3 + $0x58] sm:$0xf0]  ;;  %v2892_v46 = vor.u32 %v3549_v36, %v2889_v37 }
  0xb2   :  { %v823_v15 = vrot.slane %v822_v9, 2  ;;  %v740_v60 = vpop.f32.mrf.mxu3  ;;  %v3512_v49 = vld [vmem:[%s5355_s3 + $0x118] sm:$0xf0] }
  0xb3   :  { %v818_v19 = vadd.f32 %v817_v12, %v816_v5  ;;  %v3525_v5 = vld [vmem:[%s5355_s3 + $0x184] sm:$0xf]  ;;  %v727_v12 = vadd.f32 %v726_v53, %v471_v25 }
  0xb4   :  { %v824_v24 = vadd.f32 %v823_v15, %v822_v9  ;;  %v2667_v9 = vld [vmem:[%s5355_s3 + $0x80] sm:$0xf]  ;;  %v2796_v10 = vor.u32 %v3525_v5, %v2793_v6  ;;  %v2776_v15 = vor.u32 %v3521_v2, %v2775_v1  ;;  %v3485_v1 = vld [vmem:[%s5355_s3 + $0x40] sm:$0xf0] }
  0xb5   :  { %v819_v28 = vrot.slane %v818_v19, 1  ;;  %1494 = vmatpush.bf16.msrb.mxu3 %v2940_v39  ;;  %v741_v25 = vadd.f32 %v740_v60, %v727_v12  ;;  %v2619_v12 = vld [vmem:[%s5355_s3 + $0x20] sm:$0xf] }
  0xb6   :  { %v825_v30 = vrot.slane %v824_v24, 1  ;;  %1485 = vmatpush.bf16.msrb.mxu2 %v2796_v10 }
  0xb7   :  { %v820_v59 = vadd.f32 %v819_v28, %v818_v19  ;;  %v2764_v28 = vor.u32 %v3518_v20, %v2763_v17  ;;  %v2715_v17 = vld [vmem:[%s5355_s3 + $0xe0] sm:$0xf] }
  0xb8   :  { %v826_v35 = vadd.f32 %v825_v30, %v824_v24  ;;  %v2668_v24 = vor.u32 %v3494_v16, %v2667_v9  ;;  %v3491_v30 = vld [vmem:[%s5355_s3 + $0x70] sm:$0xf0] }
  0xb9   :  { %v828_v40 = vsel %vm827_vm0, %v808_v27, %v820_v59  ;;  %1495 = vmatpush.bf16.msrb.mxu3 %v2928_v58 }
  0xba   :  { %v830_v43 = vmul.f32 0.125, %v828_v40  ;;  %v829_v44 = vsel %vm827_vm0, %v814_v29, %v826_v35  ;;  %v2655_v29 = vld [vmem:[%s5355_s3 + $0x68] sm:$0xf] }
  0xbb   :  { %v831_v47 = vmul.f32 0.125, %v829_v44  ;;  %v2656_v39 = vor.u32 %v3491_v30, %v2655_v29  ;;  %v2643_v44 = vld [vmem:[%s5355_s3 + $0x50] sm:$0xf]  ;;  %v2703_v30 = vld [vmem:[%s5355_s3 + $0xc8] sm:$0xf] }
  0xbc   :  { %v4481_v54 = vpack.c.bf16 %v830_v43, %v830_v43  ;;  %v2752_v43 = vor.u32 %v3515_v34, %v2751_v33 }
  0xbd   :  { %v4490_v0 = vpack.c.bf16 %v831_v47, %v831_v47  ;;  %1496 = vmatpush.bf16.msrb.mxu3 %v2916_v18  ;;  %v3506_v18 = vld [vmem:[%s5355_s3 + $0xe8] sm:$0xf0] }
  0xbe   :  { %1408 = vmatmul.bf16.vlgmr.msra.gmra.mxu0 %v4481_v54 }
  0xbf   :  { %1421 = vmatmul.bf16.vlgmr.msra.gmra.mxu1 %v4490_v0  ;;  %1504 = vmatpush.bf16.msra.mxu0 %v2692_v48  ;;  %v2739_v48 = vld [vmem:[%s5355_s3 + $0x110] sm:$0xf] }
  0xc0   :  { %v752_v62 = vpop.f32.mrf.mxu0  ;;  %1517 = vmatpush.bf16.msra.mxu1 %v2788_v55  ;;  %v2644_v55 = vor.u32 %v3488_v45, %v2643_v44  ;;  %v2740_v60 = vor.u32 %v3512_v49, %v2739_v48  ;;  %v2871_v48 = vld [vmem:[%s5355_s3 + $0x218] sm:$0xf]  ;;  %v3545_v49 = vld [vmem:[%s5355_s3 + $0x220] sm:$0xf0] }
  0xc1   :  { %v753_v3 = vadd.f32 %v752_v62, %v739_v52  ;;  %v766_v4 = vpop.f32.mrf.mxu1  ;;  %1497 = vmatpush.bf16.msrb.mxu3 %v2904_v31  ;;  %v2631_v62 = vld [vmem:[%s5355_s3 + $0x38] sm:$0xf]  ;;  %v3503_v31 = vld [vmem:[%s5355_s3 + $0xd0] sm:$0xf0] }
  0xc2   :  { %v767_v19 = vadd.f32 %v766_v4, %v472_v63  ;;  %v3509_v4 = vld [vmem:[%s5355_s3 + $0x100] sm:$0xf0]  ;;  %v2704_v36 = vor.u32 %v3503_v31, %v2703_v30  ;;  %v2907_v31 = vld [vmem:[%s5355_s3 + $0x260] sm:$0xf] }
  0xc3   :  { %v799_v14 = vmax.f32 %v753_v3, 0.0  ;;  %1505 = vmatpush.bf16.msra.mxu0 %v2680_v8  ;;  %v2727_v3 = vld [vmem:[%s5355_s3 + $0xf8] sm:$0xf]  ;;  %v2632_v8 = vor.u32 %v3485_v1, %v2631_v62  ;;  %v2847_v1 = vld [vmem:[%s5355_s3 + $0x1e8] sm:$0xf] }
  0xc4   :  { %1518 = vmatpush.bf16.msra.mxu1 %v2776_v15  ;;  %v2728_v11 = vor.u32 %v3509_v4, %v2727_v3  ;;  %v3569_v3 = vld [vmem:[%s5355_s3 + $0x2e0] sm:$0xf0] }
  0xc5   :  { %v833_v23 = vsel %vm832_vm1, %v799_v14, 0.0  ;;  %v851_v50 = vrot.slane %v799_v14, 7  ;;  %1498 = vmatpush.bf16.msrb.mxu3 %v2892_v46  ;;  %v3482_v14 = vld [vmem:[%s5355_s3 + $0x28] sm:$0xf0] }
  0xc6   :  { %v834_v26 = vrot.slane %v833_v23, 4  ;;  %v2620_v22 = vor.u32 %v3482_v14, %v2619_v12  ;;  %v2823_v12 = vld [vmem:[%s5355_s3 + $0x1b8] sm:$0xf]  ;;  %v3533_v14 = vld [vmem:[%s5355_s3 + $0x1c0] sm:$0xf0] }
  0xc7   :  { %1506 = vmatpush.bf16.msra.mxu0 %v2668_v24 }
  0xc8   :  { %v780_v27 = vpop.f32.mrf.mxu2  ;;  %v754_v61 = vpop.f32.mrf.mxu0  ;;  %v835_v40 = vadd.f32 %v834_v26, %v833_v23  ;;  %1519 = vmatpush.bf16.msra.mxu1 %v2764_v28  ;;  %v2607_v26 = vld [vmem:[%s5355_s3 + $0x8] sm:$0xf] }
  0xc9   :  { %v781_v32 = vadd.f32 %v780_v27, %v767_v19  ;;  %v794_v59 = vpop.f32.mrf.mxu3  ;;  %v755_v35 = vadd.f32 %v754_v61, %v741_v25  ;;  %v768_v42 = vpop.f32.mrf.mxu1  ;;  %v2716_v25 = vor.u32 %v3506_v18, %v2715_v17  ;;  %v3479_v27 = vld [vmem:[%s5355_s3 + $0x10] sm:$0xf0]  ;;  %v2824_v17 = vor.u32 %v3533_v14, %v2823_v12  ;;  %v3017_v12 = vld [vmem:[%s5354_s2 + $0x248] sm:$0xf0] }
  0xca   :  { %v769_v53 = vadd.f32 %v768_v42, %v472_v63  ;;  %v836_v56 = vrot.slane %v835_v40, 2  ;;  %v2608_v33 = vor.u32 %v3479_v27, %v2607_v26  ;;  %v3527_v26 = vld [vmem:[%s5355_s3 + $0x190] sm:$0xf0]  ;;  %v2919_v27 = vld [vmem:[%s5355_s3 + $0x278] sm:$0xf] }
  0xcb   :  { %v795_v38 = vadd.f32 %v794_v59, %v781_v32  ;;  %v801_v41 = vmax.f32 %v755_v35, 0.0  ;;  %1507 = vmatpush.bf16.msra.mxu0 %v2656_v39  ;;  %v2883_v39 = vld [vmem:[%s5355_s3 + $0x230] sm:$0xf] }
  0xcc   :  { %1520 = vmatpush.bf16.msra.mxu1 %v2752_v43  ;;  %v837_v9 = vadd.f32 %v836_v56, %v835_v40  ;;  %v3548_v40 = vld [vmem:[%s5355_s3 + $0x238] sm:$0xf0]  ;;  %v3542_v56 = vld [vmem:[%s5355_s3 + $0x208] sm:$0xf0] }
  0xcd   :  { %v800_v47 = vmax.f32 %v795_v38, 0.0  ;;  %v852_v51 = vrot.slane %v801_v41, 7  ;;  %v2884_v44 = vor.u32 %v3548_v40, %v2883_v39  ;;  %v3442_v39 = vld [vmem:[%s5354_s2 + $0x264] sm:$0xf0] }
  0xce   :  { %1460 = vmatmul.bf16.vlgmr.msrb.gmra.mxu0 %v4481_v54  ;;  %v838_v23 = vrot.slane %v837_v9, 1 }
  0xcf   :  { %v840_v52 = vsel %vm832_vm1, %v800_v47, 0.0  ;;  %v853_v57 = vsel %vm827_vm0, %v851_v50, %v852_v51  ;;  %1473 = vmatmul.bf16.vlgmr.msrb.gmra.mxu1 %v4490_v0  ;;  %1508 = vmatpush.bf16.msra.mxu0 %v2644_v55  ;;  %v854_v20 = vrot.slane %v800_v47, 7  ;;  %v2872_v51 = vor.u32 %v3545_v49, %v2871_v48  ;;  %v2859_v55 = vld [vmem:[%s5355_s3 + $0x200] sm:$0xf]  ;;  %v3041_v48 = vld [vmem:[%s5354_s2 + $0x278] sm:$0xf0] }
  0xd0   :  { %v782_v58 = vpop.f32.mrf.mxu2  ;;  %v841_v2 = vrot.slane %v840_v52, 4  ;;  %v859_v13 = vsel %vm832_vm1, %v853_v57, 0.0  ;;  %1521 = vmatpush.bf16.msra.mxu1 %v2740_v60  ;;  %v839_v34 = vadd.f32 %v838_v23, %v837_v9  ;;  %v2860_v60 = vor.u32 %v3542_v56, %v2859_v55  ;;  %v3566_v9 = vld [vmem:[%s5355_s3 + $0x2c8] sm:$0xf0]  ;;  %v3460_v55 = vld [vmem:[%s5354_s2 + $0x2f4] sm:$0xf0] }
  0xd1   :  { %v783_v63 = vadd.f32 %v782_v58, %v769_v53  ;;  %v860_v5 = vrot.slane %v859_v13, 4  ;;  %v796_v6 = vpop.f32.mrf.mxu3  ;;  %v3441_v56 = vld [vmem:[%s5354_s2 + $0x264] sm:$0xf] }
  0xd2   :  { %v842_v15 = vadd.f32 %v841_v2, %v840_v52  ;;  %v3539_v2 = vld [vmem:[%s5355_s3 + $0x1f0] sm:$0xf0] }
  0xd3   :  { %v797_v7 = vadd.f32 %v796_v6, %v783_v63  ;;  %v861_v10 = vadd.f32 %v860_v5, %v859_v13  ;;  %1509 = vmatpush.bf16.msra.mxu0 %v2632_v8  ;;  %v2967_v63 = vld [vmem:[%s5355_s3 + $0x2d8] sm:$0xf]  ;;  %v2848_v4 = vor.u32 %v3539_v2, %v2847_v1  ;;  %v2835_v6 = vld [vmem:[%s5355_s3 + $0x1d0] sm:$0xf]  ;;  %v2955_v8 = vld [vmem:[%s5355_s3 + $0x2c0] sm:$0xf] }
  0xd4   :  { %1522 = vmatpush.bf16.msra.mxu1 %v2728_v11  ;;  %v843_v28 = vrot.slane %v842_v15, 2  ;;  %v2968_v5 = vor.u32 %v3569_v3, %v2967_v63  ;;  %v2956_v11 = vor.u32 %v3566_v9, %v2955_v8  ;;  %v3458_v2 = vld [vmem:[%s5354_s2 + $0x2e4] sm:$0xf0]  ;;  %v3025_v63 = vld [vmem:[%s5354_s2 + $0x258] sm:$0xf0] }
  0xd5   :  { %v802_v16 = vmax.f32 %v797_v7, 0.0  ;;  %v862_v19 = vrot.slane %v861_v10, 2  ;;  %v3536_v7 = vld [vmem:[%s5355_s3 + $0x1d8] sm:$0xf0] }
  0xd6   :  { %v844_v37 = vadd.f32 %v843_v28, %v842_v15  ;;  %v2943_v15 = vld [vmem:[%s5355_s3 + $0x2a8] sm:$0xf]  ;;  %v3557_v28 = vld [vmem:[%s5355_s3 + $0x280] sm:$0xf0] }
  0xd7   :  { %v855_v21 = vrot.slane %v802_v16, 7  ;;  %v863_v24 = vadd.f32 %v862_v19, %v861_v10  ;;  %1510 = vmatpush.bf16.msra.mxu0 %v2620_v22  ;;  %v2836_v10 = vor.u32 %v3536_v7, %v2835_v6  ;;  %v3563_v16 = vld [vmem:[%s5355_s3 + $0x2b0] sm:$0xf0]  ;;  %v2811_v19 = vld [vmem:[%s5355_s3 + $0x1a0] sm:$0xf]  ;;  %v2920_v30 = vor.u32 %v3557_v28, %v2919_v27 }
  0xd8   :  { %1523 = vmatpush.bf16.msra.mxu1 %v2716_v25  ;;  %v845_v45 = vrot.slane %v844_v37, 1  ;;  %v2944_v18 = vor.u32 %v3563_v16, %v2943_v15  ;;  %v3560_v22 = vld [vmem:[%s5355_s3 + $0x298] sm:$0xf0]  ;;  %v2799_v25 = vld [vmem:[%s5355_s3 + $0x188] sm:$0xf] }
  0xd9   :  { %v856_v29 = vsel %vm827_vm0, %v854_v20, %v855_v21  ;;  %v864_v32 = vrot.slane %v863_v24, 1  ;;  %v3530_v20 = vld [vmem:[%s5355_s3 + $0x1a8] sm:$0xf0]  ;;  %v2931_v21 = vld [vmem:[%s5355_s3 + $0x290] sm:$0xf] }
  0xda   :  { %v866_v59 = vsel %vm832_vm1, %v856_v29, 0.0  ;;  %v846_v52 = vadd.f32 %v845_v45, %v844_v37  ;;  %v2812_v23 = vor.u32 %v3530_v20, %v2811_v19  ;;  %v2800_v29 = vor.u32 %v3527_v26, %v2799_v25  ;;  %v3438_v45 = vld [vmem:[%s5354_s2 + $0x244] sm:$0xf0]  ;;  %v3432_v6 = vld [vmem:[%s5354_s2 + $0x214] sm:$0xf0] }
  0xdb   :  { %v867_v61 = vrot.slane %v866_v59, 4  ;;  %v865_v35 = vadd.f32 %v864_v32, %v863_v24  ;;  %1511 = vmatpush.bf16.msra.mxu0 %v2608_v33  ;;  %v2932_v24 = vor.u32 %v3560_v22, %v2931_v21  ;;  %v3554_v32 = vld [vmem:[%s5355_s3 + $0x268] sm:$0xf0]  ;;  %v3551_v33 = vld [vmem:[%s5355_s3 + $0x250] sm:$0xf0] }
  0xdc   :  { %1524 = vmatpush.bf16.msra.mxu1 %v2704_v36  ;;  %v3444_v36 = vld [vmem:[%s5354_s2 + $0x274] sm:$0xf0]  ;;  %v3087_v7 = vld [vmem:[%s5354_s2 + $0x2d0] sm:$0xf]  ;;  %v3079_v19 = vld [vmem:[%s5354_s2 + $0x2c0] sm:$0xf] }
  0xdd   :  { %v868_v38 = vadd.f32 %v867_v61, %v866_v59  ;;  %v873_v41 = vsel %vm827_vm0, %v839_v34, %v865_v35  ;;  %v2908_v59 = vor.u32 %v3554_v32, %v2907_v31  ;;  %v2895_v61 = vld [vmem:[%s5355_s3 + $0x248] sm:$0xf]  ;;  %v3039_v35 = vld [vmem:[%s5354_s2 + $0x270] sm:$0xf]  ;;  %v3435_v22 = vld [vmem:[%s5354_s2 + $0x234] sm:$0xf] }
  0xde   :  { %v875_v43 = vmul.f32 0.14285715, %v873_v41  ;;  %1512 = vmatmul.bf16.vlgmr.msra.gmra.mxu0 %v4481_v54  ;;  %v2979_v54 = vld [vmem:[%s5355_s3 + $0x2f0] sm:$0xf]  ;;  %v2896_v34 = vor.u32 %v3551_v33, %v2895_v61  ;;  %v3040_v37 = vor.u32 %v3444_v36, %v3039_v35  ;;  %v3454_v21 = vld [vmem:[%s5354_s2 + $0x2c4] sm:$0xf0] }
  0xdf   :  { %v869_v42 = vrot.slane %v868_v38, 2  ;;  %1525 = vmatmul.bf16.vlgmr.msra.gmra.mxu1 %v4490_v0  ;;  %v3572_v0 = vld [vmem:[%s5355_s3 + $0x2f8] sm:$0xf0]  ;;  %v3023_v41 = vld [vmem:[%s5354_s2 + $0x250] sm:$0xf] }
  0xe0   :  { %v4615_v47 = vpack.c.bf16 %v875_v43, %v875_v43  ;;  %v2980_v62 = vor.u32 %v3572_v0, %v2979_v54  ;;  %1804 = vmatpush.bf16.msrb.mxu0 %v3040_v37  ;;  %v3033_v54 = vld [vmem:[%s5354_s2 + $0x268] sm:$0xf0]  ;;  %v3459_v26 = vld [vmem:[%s5354_s2 + $0x2f4] sm:$0xf]  ;;  %v3105_v27 = vld [vmem:[%s5354_s2 + $0x2f8] sm:$0xf0] }
  0xe1   :  { %v870_v46 = vadd.f32 %v869_v42, %v868_v38  ;;  %v3031_v38 = vld [vmem:[%s5354_s2 + $0x260] sm:$0xf]  ;;  %v3440_v42 = vld [vmem:[%s5354_s2 + $0x254] sm:$0xf0]  ;;  %v3108_v28 = vor.u32 %v3459_v26, %v3105_v27  ;;  %v3001_v61 = vld [vmem:[%s5354_s2 + $0x228] sm:$0xf0] }
  0xe2   :  { %1434 = vmatmul.bf16.vlgmr.msra.gmra.mxu2 %v4615_v47  ;;  %v3032_v40 = vor.u32 %v3442_v39, %v3031_v38  ;;  %v3024_v43 = vor.u32 %v3440_v42, %v3023_v41  ;;  %v3457_v33 = vld [vmem:[%s5354_s2 + $0x2e4] sm:$0xf]  ;;  %v3097_v36 = vld [vmem:[%s5354_s2 + $0x2e8] sm:$0xf0]  ;;  %v3063_v37 = vld [vmem:[%s5354_s2 + $0x2a0] sm:$0xf] }
  0xe3   :  { %v871_v50 = vrot.slane %v870_v46, 1  ;;  %1530 = vmatpush.bf16.msra.mxu2 %v2884_v44  ;;  %v3015_v44 = vld [vmem:[%s5354_s2 + $0x240] sm:$0xf]  ;;  %v3450_v38 = vld [vmem:[%s5354_s2 + $0x2a4] sm:$0xf0]  ;;  %v3100_v39 = vor.u32 %v3457_v33, %v3097_v36 }
  0xe4   :  { %1805 = vmatpush.bf16.msrb.mxu0 %v3032_v40  ;;  %v3431_v40 = vld [vmem:[%s5354_s2 + $0x214] sm:$0xf]  ;;  %v2993_v41 = vld [vmem:[%s5354_s2 + $0x218] sm:$0xf0]  ;;  %v3145_v36 = vld [vmem:[%s5354_s2 + $0x348] sm:$0xf0] }
  0xe5   :  { %v872_v53 = vadd.f32 %v871_v50, %v870_v46  ;;  %v3443_v46 = vld [vmem:[%s5354_s2 + $0x274] sm:$0xf]  ;;  %v3007_v50 = vld [vmem:[%s5354_s2 + $0x230] sm:$0xf]  ;;  %v3153_v27 = vld [vmem:[%s5354_s2 + $0x358] sm:$0xf0] }
  0xe6   :  { %v3044_v49 = vor.u32 %v3443_v46, %v3041_v48  ;;  %v3455_v42 = vld [vmem:[%s5354_s2 + $0x2d4] sm:$0xf]  ;;  %v3448_v48 = vld [vmem:[%s5354_s2 + $0x294] sm:$0xf0] }
  0xe7   :  { %v874_v57 = vsel %vm827_vm0, %v846_v52, %v872_v53  ;;  %1531 = vmatpush.bf16.msra.mxu2 %v2872_v51  ;;  %v3436_v51 = vld [vmem:[%s5354_s2 + $0x234] sm:$0xf0]  ;;  %v3103_v52 = vld [vmem:[%s5354_s2 + $0x2f0] sm:$0xf]  ;;  %v3471_v26 = vld [vmem:[%s5354_s2 + $0x354] sm:$0xf] }
  0xe8   :  { %v876_v58 = vmul.f32 0.14285715, %v874_v57  ;;  %1806 = vmatpush.bf16.msrb.mxu0 %v3024_v43  ;;  %v3008_v53 = vor.u32 %v3436_v51, %v3007_v50  ;;  %v3104_v0 = vor.u32 %v3460_v55, %v3103_v52  ;;  %v3036_v57 = vor.u32 %v3441_v56, %v3033_v54  ;;  %v3429_v51 = vld [vmem:[%s5354_s2 + $0x204] sm:$0xf]  ;;  %v2985_v52 = vld [vmem:[%s5354_s2 + $0x208] sm:$0xf0] }
  0xe9   :  { %v3064_v43 = vor.u32 %v3450_v38, %v3063_v37  ;;  %v2988_v56 = vor.u32 %v3429_v51, %v2985_v52  ;;  %v3081_v54 = vld [vmem:[%s5354_s2 + $0x2c8] sm:$0xf0]  ;;  %v4968_v37 = vld [vmem:[%s5356_s4 + $0x2] ss:$8 sm:$0x7] }
  0xea   :  { %v880_v13 = vpack.c.bf16 %v876_v58, %v876_v58  ;;  %v2999_v58 = vld [vmem:[%s5354_s2 + $0x220] sm:$0xf]  ;;  %1817 = vmatpush.bf16.msrb.mxu1 %v3104_v0  ;;  %v3466_v51 = vld [vmem:[%s5354_s2 + $0x324] sm:$0xf0]  ;;  %v3465_v52 = vld [vmem:[%s5354_s2 + $0x324] sm:$0xf] }
  0xeb   :  { %1532 = vmatpush.bf16.msra.mxu2 %v2860_v60  ;;  %v3434_v60 = vld [vmem:[%s5354_s2 + $0x224] sm:$0xf0] }
  0xec   :  { %1447 = vmatmul.bf16.vlgmr.msra.gmra.mxu3 %v880_v13  ;;  %v3000_v1 = vor.u32 %v3434_v60, %v2999_v58  ;;  %v3446_v58 = vld [vmem:[%s5354_s2 + $0x284] sm:$0xf0] }
  0xed   :  { %1543 = vmatpush.bf16.msra.mxu3 %v2980_v62  ;;  %v3095_v62 = vld [vmem:[%s5354_s2 + $0x2e0] sm:$0xf] }
  0xee   :  { %v3096_v3 = vor.u32 %v3458_v2, %v3095_v62  ;;  %v3167_v62 = vld [vmem:[%s5354_s2 + $0x370] sm:$0xf]  ;;  %v3451_v2 = vld [vmem:[%s5354_s2 + $0x2b4] sm:$0xf] }
  0xef   :  { %1533 = vmatpush.bf16.msra.mxu2 %v2848_v4 }
  0xf0   :  { %1818 = vmatpush.bf16.msrb.mxu1 %v3096_v3  ;;  %v3475_v3 = vld [vmem:[%s5354_s2 + $0x374] sm:$0xf] }
  0xf1   :  { %1544 = vmatpush.bf16.msra.mxu3 %v2968_v5  ;;  %v2991_v5 = vld [vmem:[%s5354_s2 + $0x210] sm:$0xf] }
  0xf2   :  { %1486 = vmatmul.bf16.vlgmr.msrb.gmra.mxu2 %v4615_v47  ;;  %v2992_v9 = vor.u32 %v3432_v6, %v2991_v5 }
  0xf3   :  { %1534 = vmatpush.bf16.msra.mxu2 %v2836_v10  ;;  %v3456_v10 = vld [vmem:[%s5354_s2 + $0x2d4] sm:$0xf0] }
  0xf4   :  { %v3088_v15 = vor.u32 %v3456_v10, %v3087_v7  ;;  %v3474_v10 = vld [vmem:[%s5354_s2 + $0x364] sm:$0xf0] }
  0xf5   :  { %1545 = vmatpush.bf16.msra.mxu3 %v2956_v11  ;;  %v3437_v11 = vld [vmem:[%s5354_s2 + $0x244] sm:$0xf] }
  0xf6   :  { %v3020_v16 = vor.u32 %v3437_v11, %v3017_v12  ;;  %1819 = vmatpush.bf16.msrb.mxu1 %v3088_v15  ;;  %v3449_v11 = vld [vmem:[%s5354_s2 + $0x2a4] sm:$0xf] }
  0xf7   :  { %1535 = vmatpush.bf16.msra.mxu2 %v2824_v17  ;;  %v2983_v17 = vld [vmem:[%s5354_s2 + $0x200] sm:$0xf] }
  0xf9   :  { %1546 = vmatpush.bf16.msra.mxu3 %v2944_v18  ;;  %v3430_v18 = vld [vmem:[%s5354_s2 + $0x204] sm:$0xf0] }
  0xfa   :  { %v2984_v20 = vor.u32 %v3430_v18, %v2983_v17  ;;  %v3473_v17 = vld [vmem:[%s5354_s2 + $0x364] sm:$0xf]  ;;  %v3161_v18 = vld [vmem:[%s5354_s2 + $0x368] sm:$0xf0] }
  0xfb   :  { %1536 = vmatpush.bf16.msra.mxu2 %v2812_v23  ;;  %v3009_v23 = vld [vmem:[%s5354_s2 + $0x238] sm:$0xf0] }
  0xfc   :  { %1499 = vmatmul.bf16.vlgmr.msrb.gmra.mxu3 %v880_v13  ;;  %v3012_v25 = vor.u32 %v3435_v22, %v3009_v23  ;;  %v3472_v22 = vld [vmem:[%s5354_s2 + $0x354] sm:$0xf0]  ;;  %v3447_v23 = vld [vmem:[%s5354_s2 + $0x294] sm:$0xf] }
  0xfd   :  { %1547 = vmatpush.bf16.msra.mxu3 %v2932_v24  ;;  %v3080_v24 = vor.u32 %v3454_v21, %v3079_v19  ;;  %v3151_v21 = vld [vmem:[%s5354_s2 + $0x350] sm:$0xf] }
  0xff   :  { %1537 = vmatpush.bf16.msra.mxu2 %v2800_v29  ;;  %1820 = vmatpush.bf16.msrb.mxu1 %v3080_v24  ;;  %v3071_v29 = vld [vmem:[%s5354_s2 + $0x2b0] sm:$0xf]  ;;  %v3152_v24 = vor.u32 %v3472_v22, %v3151_v21 }
 0x101   :  { %1548 = vmatpush.bf16.msra.mxu3 %v2920_v30  ;;  %v3452_v30 = vld [vmem:[%s5354_s2 + $0x2b4] sm:$0xf0] }
 0x102   :  { %1538 = vmatmul.bf16.vlgmr.msra.gmra.mxu2 %v4615_v47  ;;  %v3016_v47 = vor.u32 %v3438_v45, %v3015_v44  ;;  %v3072_v32 = vor.u32 %v3452_v30, %v3071_v29  ;;  %v2996_v44 = vor.u32 %v3431_v40, %v2993_v41  ;;  %v3089_v45 = vld [vmem:[%s5354_s2 + $0x2d8] sm:$0xf0]  ;;  %v3156_v29 = vor.u32 %v3471_v26, %v3153_v27  ;;  %v3135_v40 = vld [vmem:[%s5354_s2 + $0x330] sm:$0xf]  ;;  %v3468_v41 = vld [vmem:[%s5354_s2 + $0x334] sm:$0xf0] }
 0x103   :  { %v3092_v46 = vor.u32 %v3455_v42, %v3089_v45  ;;  %v3467_v42 = vld [vmem:[%s5354_s2 + $0x334] sm:$0xf]  ;;  %v3137_v45 = vld [vmem:[%s5354_s2 + $0x338] sm:$0xf0] }
 0x104   :  { %1807 = vmatpush.bf16.msrb.mxu0 %v3016_v47  ;;  %1821 = vmatpush.bf16.msrb.mxu1 %v3072_v32  ;;  %v3055_v47 = vld [vmem:[%s5354_s2 + $0x290] sm:$0xf]  ;;  %v3470_v32 = vld [vmem:[%s5354_s2 + $0x344] sm:$0xf0] }
 0x105   :  { %1549 = vmatpush.bf16.msra.mxu3 %v2908_v59  ;;  %v3433_v59 = vld [vmem:[%s5354_s2 + $0x224] sm:$0xf]  ;;  %v3056_v50 = vor.u32 %v3448_v48, %v3055_v47 }
 0x106   :  { %v3004_v35 = vor.u32 %v3433_v59, %v3001_v61  ;;  %v3445_v59 = vld [vmem:[%s5354_s2 + $0x284] sm:$0xf] }
 0x108   :  { %1808 = vmatpush.bf16.msrb.mxu0 %v3008_v53  ;;  %1822 = vmatpush.bf16.msrb.mxu1 %v3064_v43  ;;  %v3453_v53 = vld [vmem:[%s5354_s2 + $0x2c4] sm:$0xf]  ;;  %v882_v43 = vperm.slane %v4968_v37, 0 }
 0x109   :  { %1550 = vmatpush.bf16.msra.mxu3 %v2896_v34  ;;  %v3084_v0 = vor.u32 %v3453_v53, %v3081_v54 }
 0x10c   :  { %1551 = vmatmul.bf16.vlgmr.msra.gmra.mxu3 %v880_v13  ;;  %v3439_v13 = vld [vmem:[%s5354_s2 + $0x254] sm:$0xf]  ;;  %1809 = vmatpush.bf16.msrb.mxu0 %v3000_v1  ;;  %v3476_v1 = vld [vmem:[%s5354_s2 + $0x374] sm:$0xf0] }
 0x10d   :  { %1843 = vmatpush.bf16.msrb.mxu3 %v3044_v49  ;;  %v3028_v4 = vor.u32 %v3439_v13, %v3025_v63  ;;  %1823 = vmatpush.bf16.msrb.mxu1 %v3056_v50  ;;  %v3168_v13 = vor.u32 %v3476_v1, %v3167_v62  ;;  %v3073_v63 = vld [vmem:[%s5354_s2 + $0x2b8] sm:$0xf0]  ;;  %v3127_v50 = vld [vmem:[%s5354_s2 + $0x320] sm:$0xf]  ;;  %v3463_v62 = vld [vmem:[%s5354_s2 + $0x314] sm:$0xf] }
 0x10e   :  { %v3076_v5 = vor.u32 %v3451_v2, %v3073_v63  ;;  %v3128_v54 = vor.u32 %v3466_v51, %v3127_v50  ;;  %v3618_v51 = vld [vmem:[%s5355_s3 + $0x46c] sm:$0xf] }
 0x10f   :  { %1830 = vmatpush.bf16.msrb.mxu2 %v3168_v13 }
 0x110   :  { %1810 = vmatpush.bf16.msrb.mxu0 %v2992_v9  ;;  %v3159_v9 = vld [vmem:[%s5354_s2 + $0x360] sm:$0xf] }
 0x111   :  { %1844 = vmatpush.bf16.msrb.mxu3 %v3036_v57  ;;  %v3047_v57 = vld [vmem:[%s5354_s2 + $0x280] sm:$0xf]  ;;  %v3160_v15 = vor.u32 %v3474_v10, %v3159_v9 }
 0x112   :  { %v3048_v60 = vor.u32 %v3446_v58, %v3047_v57  ;;  %v3119_v57 = vld [vmem:[%s5354_s2 + $0x310] sm:$0xf]  ;;  %v3464_v58 = vld [vmem:[%s5354_s2 + $0x314] sm:$0xf0] }
 0x113   :  { %1831 = vmatpush.bf16.msrb.mxu2 %v3160_v15  ;;  %v3120_v1 = vor.u32 %v3464_v58, %v3119_v57  ;;  %v883_v15 = vperm.slane %v4968_v37, 1  ;;  %v3307_v57 = vld [vmem:[%s5355_s3 + $0x408] sm:$0xf]  ;;  %v3607_v58 = vld [vmem:[%s5355_s3 + $0x410] sm:$0xf0] }
 0x114   :  { %1811 = vmatpush.bf16.msrb.mxu0 %v2984_v20  ;;  %1824 = vmatpush.bf16.msrb.mxu1 %v3048_v60  ;;  %v3164_v20 = vor.u32 %v3473_v17, %v3161_v18  ;;  %v3355_v18 = vld [vmem:[%s5355_s3 + $0x468] sm:$0xf] }
 0x115   :  { %1845 = vmatpush.bf16.msrb.mxu3 %v3028_v4  ;;  %v3169_v4 = vld [vmem:[%s5354_s2 + $0x378] sm:$0xf0] }
 0x116   :  { %v3172_v6 = vor.u32 %v3475_v3, %v3169_v4 }
 0x117   :  { %1832 = vmatpush.bf16.msrb.mxu2 %v3152_v24 }
 0x118   :  { %1856 = vmatpush.bf16.msra.mxu0 %v3108_v28  ;;  %1869 = vmatpush.bf16.msra.mxu1 %v3172_v6  ;;  %v3462_v6 = vld [vmem:[%s5354_s2 + $0x304] sm:$0xf0] }
 0x119   :  { %1846 = vmatpush.bf16.msrb.mxu3 %v3020_v16  ;;  %v3065_v16 = vld [vmem:[%s5354_s2 + $0x2a8] sm:$0xf0] }
 0x11a   :  { %v3068_v19 = vor.u32 %v3449_v11, %v3065_v16 }
 0x11c   :  { %1857 = vmatpush.bf16.msra.mxu0 %v3100_v39  ;;  %1870 = vmatpush.bf16.msra.mxu1 %v3164_v20  ;;  %v3343_v20 = vld [vmem:[%s5355_s3 + $0x450] sm:$0xf] }
 0x11d   :  { %1847 = vmatpush.bf16.msrb.mxu3 %v3012_v25  ;;  %v3057_v25 = vld [vmem:[%s5354_s2 + $0x298] sm:$0xf0] }
 0x11e   :  { %v3060_v28 = vor.u32 %v3447_v23, %v3057_v25  ;;  %v3616_v23 = vld [vmem:[%s5355_s3 + $0x458] sm:$0xf0] }
 0x11f   :  { %v3344_v24 = vor.u32 %v3616_v23, %v3343_v20  ;;  %v3283_v20 = vld [vmem:[%s5355_s3 + $0x3d8] sm:$0xf] }
 0x120   :  { %1858 = vmatpush.bf16.msra.mxu0 %v3092_v46  ;;  %1871 = vmatpush.bf16.msra.mxu1 %v3156_v29  ;;  %v3140_v46 = vor.u32 %v3467_v42, %v3137_v45  ;;  %v3592_v45 = vld [vmem:[%s5355_s3 + $0x398] sm:$0xf0] }
 0x121   :  { %1848 = vmatpush.bf16.msrb.mxu3 %v3004_v35  ;;  %v3469_v35 = vld [vmem:[%s5354_s2 + $0x344] sm:$0xf] }
 0x122   :  { %v3148_v39 = vor.u32 %v3469_v35, %v3145_v36 }
 0x124   :  { %1859 = vmatpush.bf16.msra.mxu0 %v3084_v0  ;;  %1872 = vmatpush.bf16.msra.mxu1 %v3148_v39  ;;  %v3129_v0 = vld [vmem:[%s5354_s2 + $0x328] sm:$0xf0] }
 0x125   :  { %1849 = vmatpush.bf16.msrb.mxu3 %v2996_v44  ;;  %v3136_v44 = vor.u32 %v3468_v41, %v3135_v40  ;;  %v3132_v60 = vor.u32 %v3465_v52, %v3129_v0  ;;  %v3595_v41 = vld [vmem:[%s5355_s3 + $0x3b0] sm:$0xf0]  ;;  %v3357_v52 = vld [vmem:[%s5355_s3 + $0x474] sm:$0xf0] }
 0x128   :  { %1860 = vmatpush.bf16.msra.mxu0 %v3076_v5  ;;  %1873 = vmatpush.bf16.msra.mxu1 %v3140_v46  ;;  %v3111_v5 = vld [vmem:[%s5354_s2 + $0x300] sm:$0xf] }
 0x129   :  { %1850 = vmatpush.bf16.msrb.mxu3 %v2988_v56  ;;  %v3112_v10 = vor.u32 %v3462_v6, %v3111_v5  ;;  %v3295_v6 = vld [vmem:[%s5355_s3 + $0x3f0] sm:$0xf] }
 0x12c   :  { %1861 = vmatpush.bf16.msra.mxu0 %v3068_v19  ;;  %1874 = vmatpush.bf16.msra.mxu1 %v3132_v60  ;;  %v3619_v19 = vld [vmem:[%s5355_s3 + $0x470] sm:$0xf0] }
 0x12d   :  { %v3356_v22 = vor.u32 %v3619_v19, %v3355_v18  ;;  %v3615_v60 = vld [vmem:[%s5355_s3 + $0x454] sm:$0xf]  ;;  %v3249_v18 = vld [vmem:[%s5355_s3 + $0x39c] sm:$0xf0] }
 0x12f   :  { %2162 = vmatpush.bf16.msra.mxu3 %v3356_v22  ;;  %v3609_v22 = vld [vmem:[%s5355_s3 + $0x424] sm:$0xf] }
 0x130   :  { %1862 = vmatpush.bf16.msra.mxu0 %v3060_v28 }
 0x133   :  { %2163 = vmatpush.bf16.msra.mxu3 %v3344_v24  ;;  %v3321_v24 = vld [vmem:[%s5355_s3 + $0x42c] sm:$0xf0] }
 0x13b   :  { %v4788_v8 = vpop.f32.mrf.mxu0 }
 0x13c   :  { %v4799_v14 = vpop.f32.mrf.mxu1  ;;  %v1410_v53 = vadd.f32 %v4788_v8, %v882_v43  ;;  %v3121_v8 = vld [vmem:[%s5354_s2 + $0x318] sm:$0xf0]  ;;  %v3247_v43 = vld [vmem:[%s5355_s3 + $0x390] sm:$0xf] }
 0x13d   :  { %v3124_v2 = vor.u32 %v3463_v62, %v3121_v8  ;;  %v3248_v46 = vor.u32 %v3592_v45, %v3247_v43  ;;  %v3308_v62 = vor.u32 %v3607_v58, %v3307_v57  ;;  %v3345_v8 = vld [vmem:[%s5355_s3 + $0x45c] sm:$0xf0]  ;;  %v3351_v45 = vld [vmem:[%s5355_s3 + $0x458] sm:$0xf] }
 0x13e   :  { %v1423_v13 = vadd.f32 %v4799_v14, %v1410_v53  ;;  %v3113_v14 = vld [vmem:[%s5354_s2 + $0x308] sm:$0xf0]  ;;  %v3360_v53 = vor.u32 %v3618_v51, %v3357_v52 }
 0x13f   :  { %1875 = vmatpush.bf16.msra.mxu1 %v3124_v2  ;;  %v3586_v2 = vld [vmem:[%s5355_s3 + $0x368] sm:$0xf0] }
 0x140   :  { %v3574_v51 = vld [vmem:[%s5355_s3 + $0x308] sm:$0xf0] }
 0x141   :  { %v3582_v52 = vld [vmem:[%s5355_s3 + $0x34c] sm:$0xf] }
 0x143   :  { %v1411_v31 = vpop.f32.mrf.mxu0 }
 0x144   :  { %v1424_v34 = vpop.f32.mrf.mxu1  ;;  %v3143_v31 = vld [vmem:[%s5354_s2 + $0x340] sm:$0xf] }
 0x145   :  { %v3144_v33 = vor.u32 %v3470_v32, %v3143_v31  ;;  %v3049_v34 = vld [vmem:[%s5354_s2 + $0x288] sm:$0xf0]  ;;  %v884_v32 = vperm.slane %v4968_v37, 2  ;;  %v3259_v37 = vld [vmem:[%s5355_s3 + $0x3a8] sm:$0xf] }
 0x146   :  { %v3052_v38 = vor.u32 %v3445_v59, %v3049_v34  ;;  %v3260_v42 = vor.u32 %v3595_v41, %v3259_v37 }
 0x147   :  { %1833 = vmatpush.bf16.msrb.mxu2 %v3144_v33 }
 0x148   :  { %1863 = vmatpush.bf16.msra.mxu0 %v3052_v38 }
 0x14b   :  { %v4867_v49 = vpop.f32.mrf.mxu0  ;;  %1834 = vmatpush.bf16.msrb.mxu2 %v3136_v44 }
 0x14c   :  { %v4878_v55 = vpop.f32.mrf.mxu1  ;;  %v1462_v21 = vadd.f32 %v4867_v49, %v883_v15  ;;  %v3583_v15 = vld [vmem:[%s5355_s3 + $0x350] sm:$0xf0] }
 0x14e   :  { %v1475_v25 = vadd.f32 %v4878_v55, %v1462_v21  ;;  %v3601_v21 = vld [vmem:[%s5355_s3 + $0x3e0] sm:$0xf0] }
 0x14f   :  { %1835 = vmatpush.bf16.msrb.mxu2 %v3128_v54  ;;  %v3589_v54 = vld [vmem:[%s5355_s3 + $0x380] sm:$0xf0]  ;;  %v3284_v23 = vor.u32 %v3601_v21, %v3283_v20  ;;  %v3590_v21 = vld [vmem:[%s5355_s3 + $0x388] sm:$0xf0] }
 0x153   :  { %v1463_v7 = vpop.f32.mrf.mxu0  ;;  %1836 = vmatpush.bf16.msrb.mxu2 %v3120_v1  ;;  %v3223_v1 = vld [vmem:[%s5355_s3 + $0x360] sm:$0xf] }
 0x154   :  { %v1476_v12 = vpop.f32.mrf.mxu1  ;;  %v3461_v7 = vld [vmem:[%s5354_s2 + $0x304] sm:$0xf] }
 0x155   :  { %v3116_v11 = vor.u32 %v3461_v7, %v3113_v14  ;;  %v3604_v7 = vld [vmem:[%s5355_s3 + $0x3f8] sm:$0xf0]  ;;  %v3333_v14 = vld [vmem:[%s5355_s3 + $0x444] sm:$0xf0] }
 0x157   :  { %1837 = vmatpush.bf16.msrb.mxu2 %v3112_v10  ;;  %1876 = vmatpush.bf16.msra.mxu1 %v3116_v11  ;;  %v3612_v10 = vld [vmem:[%s5355_s3 + $0x43c] sm:$0xf] }
 0x158   :  { %v3336_v11 = vor.u32 %v3612_v10, %v3333_v14  ;;  %v3597_v10 = vld [vmem:[%s5355_s3 + $0x3c4] sm:$0xf]  ;;  %v3273_v14 = vld [vmem:[%s5355_s3 + $0x3cc] sm:$0xf0] }
 0x15b   :  { %v4943_v30 = vpop.f32.mrf.mxu0  ;;  %2149 = vmatpush.bf16.msra.mxu2 %v3260_v42  ;;  %v3585_v42 = vld [vmem:[%s5355_s3 + $0x364] sm:$0xf] }
 0x15c   :  { %v4954_v61 = vpop.f32.mrf.mxu1  ;;  %v1514_v33 = vadd.f32 %v4943_v30, %v884_v32  ;;  %v3331_v30 = vld [vmem:[%s5355_s3 + $0x438] sm:$0xf]  ;;  %v3271_v32 = vld [vmem:[%s5355_s3 + $0x3c0] sm:$0xf] }
 0x15e   :  { %v1527_v34 = vadd.f32 %v4954_v61, %v1514_v33  ;;  %v3613_v61 = vld [vmem:[%s5355_s3 + $0x440] sm:$0xf0] }
 0x15f   :  { %v3332_v44 = vor.u32 %v3613_v61, %v3331_v30  ;;  %2150 = vmatpush.bf16.msra.mxu2 %v3248_v46  ;;  %v3225_v30 = vld [vmem:[%s5355_s3 + $0x36c] sm:$0xf0]  ;;  %v3603_v61 = vld [vmem:[%s5355_s3 + $0x3f4] sm:$0xf]  ;;  %v3617_v46 = vld [vmem:[%s5355_s3 + $0x460] sm:$0xf0] }
 0x160   :  { %v3228_v43 = vor.u32 %v3585_v42, %v3225_v30  ;;  %v3581_v30 = vld [vmem:[%s5355_s3 + $0x340] sm:$0xf0] }
 0x161   :  { %2164 = vmatpush.bf16.msra.mxu3 %v3332_v44  ;;  %v3297_v44 = vld [vmem:[%s5355_s3 + $0x3fc] sm:$0xf0] }
 0x163   :  { %v1515_v48 = vpop.f32.mrf.mxu0 }
 0x164   :  { %v1528_v56 = vpop.f32.mrf.mxu1  ;;  %v3610_v48 = vld [vmem:[%s5355_s3 + $0x428] sm:$0xf0] }
 0x165   :  { %v1435_v47 = vpop.f32.mrf.mxu2  ;;  %v3235_v56 = vld [vmem:[%s5355_s3 + $0x378] sm:$0xf] }
 0x166   :  { %v1436_v63 = vadd.f32 %v1435_v47, %v1423_v13  ;;  %v3319_v47 = vld [vmem:[%s5355_s3 + $0x420] sm:$0xf]  ;;  %v3236_v0 = vor.u32 %v3589_v54, %v3235_v56  ;;  %v3348_v13 = vor.u32 %v3615_v60, %v3345_v8  ;;  %v3213_v56 = vld [vmem:[%s5355_s3 + $0x354] sm:$0xf0]  ;;  %v3267_v54 = vld [vmem:[%s5355_s3 + $0x3b0] sm:$0xf] }
 0x167   :  { %v3320_v50 = vor.u32 %v3610_v48, %v3319_v47  ;;  %v3300_v47 = vor.u32 %v3603_v61, %v3297_v44  ;;  %v3352_v48 = vor.u32 %v3617_v46, %v3351_v45  ;;  %v3216_v57 = vor.u32 %v3582_v52, %v3213_v56  ;;  %v3600_v60 = vld [vmem:[%s5355_s3 + $0x3dc] sm:$0xf]  ;;  %v3339_v8 = vld [vmem:[%s5355_s3 + $0x440] sm:$0xf]  ;;  %v3279_v61 = vld [vmem:[%s5355_s3 + $0x3c8] sm:$0xf] }
 0x168   :  { %2151 = vmatpush.bf16.msra.mxu2 %v3236_v0  ;;  %v3596_v0 = vld [vmem:[%s5355_s3 + $0x3b8] sm:$0xf0]  ;;  %v3183_v52 = vld [vmem:[%s5355_s3 + $0x308] sm:$0xf] }
 0x169   :  { %2165 = vmatpush.bf16.msra.mxu3 %v3320_v50  ;;  %v3175_v50 = vld [vmem:[%s5355_s3 + $0x300] sm:$0xf]  ;;  %v3268_v58 = vor.u32 %v3596_v0, %v3267_v54 }
 0x16a   :  { %v2338_v56 = vld [vmem:[%s5356_s4 + $0x3] ss:$8 sm:$0x3] }
 0x16d   :  { %v1437_v3 = vpop.f32.mrf.mxu2  ;;  %2166 = vmatpush.bf16.msra.mxu3 %v3308_v62  ;;  %v3285_v62 = vld [vmem:[%s5355_s3 + $0x3e4] sm:$0xf0] }
 0x16e   :  { %v3594_v3 = vld [vmem:[%s5355_s3 + $0x3ac] sm:$0xf] }
 0x16f   :  { %v1448_v4 = vpop.f32.mrf.mxu3 }
 0x170   :  { %v1449_v9 = vadd.f32 %v1448_v4, %v1436_v63  ;;  %v3224_v63 = vor.u32 %v3586_v2, %v3223_v1  ;;  %v3261_v4 = vld [vmem:[%s5355_s3 + $0x3b4] sm:$0xf0]  ;;  %v3288_v1 = vor.u32 %v3600_v60, %v3285_v62  ;;  %v3614_v2 = vld [vmem:[%s5355_s3 + $0x448] sm:$0xf0]  ;;  %v1560_v62 = vperm.slane %v2338_v56, 0 }
 0x171   :  { %v3264_v5 = vor.u32 %v3594_v3, %v3261_v4  ;;  %v3579_v3 = vld [vmem:[%s5355_s3 + $0x334] sm:$0xf]  ;;  %v3201_v4 = vld [vmem:[%s5355_s3 + $0x33c] sm:$0xf0] }
 0x172   :  { %v1556_v12 = vpack.c.bf16 %v1449_v9, %v1449_v9  ;;  %2152 = vmatpush.bf16.msra.mxu2 %v3224_v63  ;;  %v3296_v9 = vor.u32 %v3604_v7, %v3295_v6  ;;  %v3340_v63 = vor.u32 %v3614_v2, %v3339_v8  ;;  %v3204_v6 = vor.u32 %v3579_v3, %v3201_v4  ;;  %v3593_v7 = vld [vmem:[%s5355_s3 + $0x3a0] sm:$0xf0] }
 0x174   :  { %1812 = vmatmul.bf16.vlgmr.msrb.gmra.mxu0 %v1556_v12  ;;  %1851 = vmatmul.bf16.vlgmr.msrb.gmra.mxu3 %v1556_v12  ;;  %v3211_v12 = vld [vmem:[%s5355_s3 + $0x348] sm:$0xf] }
 0x175   :  { %v1487_v16 = vpop.f32.mrf.mxu2  ;;  %2175 = vmatpush.bf16.msrb.mxu0 %v3264_v5  ;;  %2167 = vmatpush.bf16.msra.mxu3 %v3296_v9  ;;  %v3255_v5 = vld [vmem:[%s5355_s3 + $0x398] sm:$0xf] }
 0x176   :  { %v1488_v26 = vadd.f32 %v1487_v16, %v1475_v25  ;;  %v3212_v16 = vor.u32 %v3583_v15, %v3211_v12  ;;  %v3199_v25 = vld [vmem:[%s5355_s3 + $0x330] sm:$0xf]  ;;  %v3256_v9 = vor.u32 %v3593_v7, %v3255_v5  ;;  %v3276_v12 = vor.u32 %v3597_v10, %v3273_v14  ;;  %v3611_v15 = vld [vmem:[%s5355_s3 + $0x430] sm:$0xf0] }
 0x177   :  { %v1450_v17 = vpop.f32.mrf.mxu3 }
 0x178   :  { %v3591_v17 = vld [vmem:[%s5355_s3 + $0x394] sm:$0xf]  ;;  %2153 = vmatpush.bf16.msra.mxu2 %v3212_v16 }
 0x179   :  { %v3252_v19 = vor.u32 %v3591_v17, %v3249_v18  ;;  %2168 = vmatpush.bf16.msra.mxu3 %v3284_v23  ;;  %v3576_v17 = vld [vmem:[%s5355_s3 + $0x31c] sm:$0xf]  ;;  %v3189_v18 = vld [vmem:[%s5355_s3 + $0x324] sm:$0xf0] }
 0x17a   :  { %v3192_v20 = vor.u32 %v3576_v17, %v3189_v18 }
 0x17b   :  { %2176 = vmatpush.bf16.msrb.mxu0 %v3252_v19  ;;  %v3243_v19 = vld [vmem:[%s5355_s3 + $0x380] sm:$0xf] }
 0x17c   :  { %v3244_v23 = vor.u32 %v3590_v21, %v3243_v19 }
 0x17d   :  { %v1489_v27 = vpop.f32.mrf.mxu2 }
 0x17e   :  { %v3324_v27 = vor.u32 %v3609_v22, %v3321_v24  ;;  %v3315_v24 = vld [vmem:[%s5355_s3 + $0x410] sm:$0xf] }
 0x17f   :  { %v1500_v28 = vpop.f32.mrf.mxu3 }
 0x180   :  { %v1501_v29 = vadd.f32 %v1500_v28, %v1488_v26  ;;  %v3580_v26 = vld [vmem:[%s5355_s3 + $0x338] sm:$0xf0] }
 0x181   :  { %v3200_v28 = vor.u32 %v3580_v26, %v3199_v25  ;;  %v3608_v25 = vld [vmem:[%s5355_s3 + $0x418] sm:$0xf0] }
 0x182   :  { %v1557_v31 = vpack.c.bf16 %v1501_v29, %v1501_v29  ;;  %v3588_v29 = vld [vmem:[%s5355_s3 + $0x37c] sm:$0xf]  ;;  %v3316_v26 = vor.u32 %v3608_v25, %v3315_v24 }
 0x183   :  { %2154 = vmatpush.bf16.msra.mxu2 %v3200_v28  ;;  %v3573_v28 = vld [vmem:[%s5355_s3 + $0x304] sm:$0xf]  ;;  %v344_v24 = vld [vmem:[%s5353_s1 + $0x18] sm:$0xc0] }
 0x184   :  { %1825 = vmatmul.bf16.vlgmr.msrb.gmra.mxu1 %v1557_v31  ;;  %1864 = vmatmul.bf16.vlgmr.msra.gmra.mxu0 %v1557_v31  ;;  %v3237_v31 = vld [vmem:[%s5355_s3 + $0x384] sm:$0xf0] }
 0x185   :  { %v1539_v49 = vpop.f32.mrf.mxu2  ;;  %2188 = vmatpush.bf16.msrb.mxu1 %v3360_v53  ;;  %v3176_v53 = vor.u32 %v3574_v51, %v3175_v50 }
 0x186   :  { %v1540_v35 = vadd.f32 %v1539_v49, %v1527_v34  ;;  %v3240_v49 = vor.u32 %v3588_v29, %v3237_v31  ;;  %v3606_v34 = vld [vmem:[%s5355_s3 + $0x40c] sm:$0xf]  ;;  %v3177_v29 = vld [vmem:[%s5355_s3 + $0x30c] sm:$0xf0]  ;;  %v3231_v31 = vld [vmem:[%s5355_s3 + $0x368] sm:$0xf] }
 0x187   :  { %v1502_v59 = vpop.f32.mrf.mxu3 }
 0x188   :  { %v3598_v59 = vld [vmem:[%s5355_s3 + $0x3c8] sm:$0xf0]  ;;  %2177 = vmatpush.bf16.msrb.mxu0 %v3240_v49  ;;  %v3587_v49 = vld [vmem:[%s5355_s3 + $0x370] sm:$0xf0] }
 0x189   :  { %2189 = vmatpush.bf16.msrb.mxu1 %v3348_v13  ;;  %v3272_v33 = vor.u32 %v3598_v59, %v3271_v32  ;;  %v3180_v32 = vor.u32 %v3573_v28, %v3177_v29  ;;  %v3232_v59 = vor.u32 %v3587_v49, %v3231_v31  ;;  %v2241_v28 = vrot.slane %v344_v24, 6 }
 0x18b   :  { %2169 = vmatpush.bf16.msra.mxu3 %v3272_v33  ;;  %v3303_v33 = vld [vmem:[%s5355_s3 + $0x3f8] sm:$0xf] }
 0x18c   :  { %2178 = vmatpush.bf16.msrb.mxu0 %v3228_v43  ;;  %v3599_v43 = vld [vmem:[%s5355_s3 + $0x3d0] sm:$0xf0] }
 0x18d   :  { %v1541_v36 = vpop.f32.mrf.mxu2  ;;  %2190 = vmatpush.bf16.msrb.mxu1 %v3336_v11  ;;  %v3327_v11 = vld [vmem:[%s5355_s3 + $0x428] sm:$0xf]  ;;  %v3280_v50 = vor.u32 %v3599_v43, %v3279_v61 }
 0x18e   :  { %v3363_v36 = vld [vmem:[%s5355_s3 + $0x470] sm:$0xf]  ;;  %v3328_v16 = vor.u32 %v3611_v15, %v3327_v11 }
 0x18f   :  { %v1552_v38 = vpop.f32.mrf.mxu3 }
 0x190   :  { %v1553_v55 = vadd.f32 %v1552_v38, %v1540_v35  ;;  %v3309_v35 = vld [vmem:[%s5355_s3 + $0x414] sm:$0xf0]  ;;  %2179 = vmatpush.bf16.msrb.mxu0 %v3216_v57 }
 0x191   :  { %2191 = vmatpush.bf16.msrb.mxu1 %v3324_v27  ;;  %v3312_v38 = vor.u32 %v3606_v34, %v3309_v35  ;;  %v3605_v34 = vld [vmem:[%s5355_s3 + $0x400] sm:$0xf0] }
 0x192   :  { %v1558_v39 = vpack.c.bf16 %v1553_v55, %v1553_v55  ;;  %v3620_v55 = vld [vmem:[%s5355_s3 + $0x478] sm:$0xf0]  ;;  %v3304_v35 = vor.u32 %v3605_v34, %v3303_v33 }
 0x193   :  { %v3364_v37 = vor.u32 %v3620_v55, %v3363_v36  ;;  %v3219_v36 = vld [vmem:[%s5355_s3 + $0x350] sm:$0xf] }
 0x194   :  { %1838 = vmatmul.bf16.vlgmr.msrb.gmra.mxu2 %v1558_v39  ;;  %1877 = vmatmul.bf16.vlgmr.msra.gmra.mxu1 %v1558_v39  ;;  %v3187_v39 = vld [vmem:[%s5355_s3 + $0x318] sm:$0xf] }
 0x195   :  { %2192 = vmatpush.bf16.msrb.mxu1 %v3312_v38  ;;  %2214 = vmatpush.bf16.msrb.mxu3 %v3364_v37  ;;  %v3584_v38 = vld [vmem:[%s5355_s3 + $0x358] sm:$0xf0]  ;;  %v3602_v37 = vld [vmem:[%s5355_s3 + $0x3e8] sm:$0xf0] }
 0x196   :  { %2180 = vmatpush.bf16.msrb.mxu0 %v3204_v6  ;;  %v3220_v55 = vor.u32 %v3584_v38, %v3219_v36  ;;  %v2340_v36 = vld [vmem:[%s5356_s4 + $0x5] ss:$8 sm:$0x7] }
 0x197   :  { %v1554_v40 = vpop.f32.mrf.mxu3 }
 0x198   :  { %v3577_v40 = vld [vmem:[%s5355_s3 + $0x320] sm:$0xf0] }
 0x199   :  { %v3188_v41 = vor.u32 %v3577_v40, %v3187_v39  ;;  %2193 = vmatpush.bf16.msrb.mxu1 %v3300_v47  ;;  %2215 = vmatpush.bf16.msrb.mxu3 %v3352_v48  ;;  %v3291_v40 = vld [vmem:[%s5355_s3 + $0x3e0] sm:$0xf]  ;;  %v3578_v48 = vld [vmem:[%s5355_s3 + $0x328] sm:$0xf0] }
 0x19a   :  { %2181 = vmatpush.bf16.msrb.mxu0 %v3192_v20  ;;  %v3292_v42 = vor.u32 %v3602_v37, %v3291_v40  ;;  %v3195_v47 = vld [vmem:[%s5355_s3 + $0x320] sm:$0xf] }
 0x19b   :  { %2155 = vmatpush.bf16.msra.mxu2 %v3188_v41  ;;  %v3207_v41 = vld [vmem:[%s5355_s3 + $0x338] sm:$0xf]  ;;  %v3196_v51 = vor.u32 %v3578_v48, %v3195_v47 }
 0x19c   :  { %v3208_v46 = vor.u32 %v3581_v30, %v3207_v41 }
 0x19d   :  { %2194 = vmatpush.bf16.msrb.mxu1 %v3288_v1  ;;  %2216 = vmatpush.bf16.msrb.mxu3 %v3340_v63 }
 0x19e   :  { %2182 = vmatpush.bf16.msrb.mxu0 %v3180_v32 }
 0x19f   :  { %2156 = vmatpush.bf16.msra.mxu2 %v3176_v53  ;;  %v3575_v53 = vld [vmem:[%s5355_s3 + $0x310] sm:$0xf0] }
 0x1a0   :  { %v3184_v57 = vor.u32 %v3575_v53, %v3183_v52 }
 0x1a1   :  { %2195 = vmatpush.bf16.msrb.mxu1 %v3276_v12  ;;  %2217 = vmatpush.bf16.msrb.mxu3 %v3328_v16 }
 0x1a3   :  { %2201 = vmatpush.bf16.msrb.mxu2 %v3268_v58  ;;  %v1561_v58 = vperm.slane %v2338_v56, 1 }
 0x1a5   :  { %2218 = vmatpush.bf16.msrb.mxu3 %v3316_v26  ;;  %v345_v26 = vld [vmem:[%s5353_s1 + $0x20] sm:$0xc0] }
 0x1a6   :  { %v2242_v32 = vrot.slane %v345_v26, 6 }
 0x1a7   :  { %2202 = vmatpush.bf16.msrb.mxu2 %v3256_v9 }
 0x1a9   :  { %2219 = vmatpush.bf16.msrb.mxu3 %v3304_v35  ;;  %v346_v35 = vld [vmem:[%s5353_s1 + $0x28] sm:$0xc0] }
 0x1aa   :  { %v2243_v37 = vrot.slane %v346_v35, 6 }
 0x1ab   :  { %2203 = vmatpush.bf16.msrb.mxu2 %v3244_v23 }
 0x1ad   :  { %2220 = vmatpush.bf16.msrb.mxu3 %v3292_v42  ;;  %v2288_v42 = vperm.slane %v2340_v36, 1 }
 0x1af   :  { %2204 = vmatpush.bf16.msrb.mxu2 %v3232_v59 }
 0x1b1   :  { %2221 = vmatpush.bf16.msrb.mxu3 %v3280_v50 }
 0x1b3   :  { %2205 = vmatpush.bf16.msrb.mxu2 %v3220_v55  ;;  %v2287_v55 = vperm.slane %v2340_v36, 0 }
 0x1b7   :  { %2206 = vmatpush.bf16.msrb.mxu2 %v3208_v46 }
 0x1bb   :  { %2207 = vmatpush.bf16.msrb.mxu2 %v3196_v51 }
 0x1bf   :  { %2208 = vmatpush.bf16.msrb.mxu2 %v3184_v57 }
 0x1f1   :  { %v5219_v13 = vpop.f32.mrf.mxu0 }
 0x1f2   :  { %v1814_v63 = vadd.f32 %v5219_v13, %v1560_v62  ;;  %v2339_v13 = vld [vmem:[%s5356_s4 + $0x4] ss:$8 sm:$0x7] }
 0x1f3   :  { %v1887_v18 = vperm.slane %v2339_v13, 0  ;;  %v1888_v20 = vperm.slane %v2339_v13, 1  ;;  %v1889_v34 = vperm.slane %v2339_v13, 2 }
 0x1f7   :  { %v1852_v22 = vpop.f32.mrf.mxu3 }
 0x1f8   :  { %v1853_v60 = vadd.f32 %v1852_v22, %v1561_v58 }
 0x1f9   :  { %v1815_v27 = vpop.f32.mrf.mxu0 }
 0x1ff   :  { %v1854_v39 = vpop.f32.mrf.mxu3 }
 0x201   :  { %v1826_v44 = vpop.f32.mrf.mxu1  ;;  %v1865_v45 = vpop.f32.mrf.mxu0 }
 0x202   :  { %v1866_v8 = vadd.f32 %v1865_v45, %v1853_v60  ;;  %v1827_v4 = vadd.f32 %v1826_v44, %v1814_v63  ;;  %v2289_v45 = vperm.slane %v2340_v36, 2 }
 0x209   :  { %v1828_v54 = vpop.f32.mrf.mxu1  ;;  %v1867_v0 = vpop.f32.mrf.mxu0 }
 0x211   :  { %v1878_v1 = vpop.f32.mrf.mxu1 }
 0x212   :  { %v1879_v2 = vadd.f32 %v1878_v1, %v1866_v8 }
 0x214   :  { %v1883_v3 = vmax.f32 %v1879_v2, 0.0 }
 0x216   :  { %v1885_v5 = vpack.c.bf16 %v1883_v3, %v1883_v3 }
 0x217   :  { %v1839_v6 = vpop.f32.mrf.mxu2 }
 0x218   :  { %v1840_v7 = vadd.f32 %v1839_v6, %v1827_v4  ;;  %2170 = vmatmul.bf16.vlgmr.msra.gmra.mxu3 %v1885_v5  ;;  %2196 = vmatmul.bf16.vlgmr.msrb.gmra.mxu1 %v1885_v5 }
 0x219   :  { %v1880_v9 = vpop.f32.mrf.mxu1 }
 0x21a   :  { %v1882_v10 = vmax.f32 %v1840_v7, 0.0 }
 0x21c   :  { %v1884_v14 = vpack.c.bf16 %v1882_v10, %v1882_v10 }
 0x21e   :  { %2157 = vmatmul.bf16.vlgmr.msra.gmra.mxu2 %v1884_v14  ;;  %2183 = vmatmul.bf16.vlgmr.msrb.gmra.mxu0 %v1884_v14 }
 0x21f   :  { %v1841_v11 = vpop.f32.mrf.mxu2 }
 0x228   :  { %2222 = vmatmul.bf16.vlgmr.msrb.gmra.mxu3 %v1885_v5 }
 0x22e   :  { %2209 = vmatmul.bf16.vlgmr.msrb.gmra.mxu2 %v1884_v14 }
 0x295   :  { %v2197_v12 = vpop.f32.mrf.mxu1 }
 0x29b   :  { %v2171_v15 = vpop.f32.mrf.mxu3  ;;  %v2184_v16 = vpop.f32.mrf.mxu0 }
 0x29c   :  { %v2185_v25 = vadd.f32 %v2184_v16, %v1888_v20 }
 0x29d   :  { %v2199_v17 = vpop.f32.mrf.mxu1 }
 0x29e   :  { %v2198_v31 = vadd.f32 %v2197_v12, %v2185_v25 }
 0x2a0   :  { %v2248_v33 = vsub.f32 %v2198_v31, %v2242_v32  ;;  %v2230_v44 = vrot.slane %v2198_v31, 6 }
 0x2a1   :  { %v2158_v19 = vpop.f32.mrf.mxu2 }
 0x2a2   :  { %v2159_v23 = vadd.f32 %v2158_v19, %v1887_v18  ;;  %v2251_v41 = vmul.f32 %v2248_v33, %v2248_v33  ;;  %v2269_v3 = vand.u32 2147483647, %v2248_v33 }
 0x2a3   :  { %v2173_v21 = vpop.f32.mrf.mxu3  ;;  %v2186_v22 = vpop.f32.mrf.mxu0 }
 0x2a4   :  { %v2172_v27 = vadd.f32 %v2171_v15, %v2159_v23  ;;  %v2294_v50 = vmul.f32 %v2288_v42, %v2251_v41  ;;  %v2254_v56 = vsel %vm2232_vm2, %v2251_v41, 0.0  ;;  %v2272_v7 = vsel %vm2232_vm2, %v2269_v3, 0.0 }
 0x2a6   :  { %v2247_v59 = vsub.f32 %v2172_v27, %v2241_v28  ;;  %v2233_v51 = vsel %vm2232_vm2, %v2172_v27, %v2230_v44  ;;  %v2297_v62 = vsel %vm2232_vm2, %v2294_v50, 0.0 }
 0x2a8   :  { %v2250_v38 = vmul.f32 %v2247_v59, %v2247_v59  ;;  %v2268_v8 = vand.u32 2147483647, %v2247_v59 }
 0x2a9   :  { %v2160_v29 = vpop.f32.mrf.mxu2 }
 0x2aa   :  { %v2293_v43 = vmul.f32 %v2287_v55, %v2250_v38  ;;  %v2253_v48 = vsel %vm2232_vm2, %v2250_v38, 0.0  ;;  %v2271_v6 = vsel %vm2232_vm2, %v2268_v8, 0.0 }
 0x2ab   :  { %v2223_v49 = vpop.f32.mrf.mxu3  ;;  %v2255_v57 = vadd.f32 %v2254_v56, %v2253_v48  ;;  %v2273_v10 = vadd.f32 %v2272_v7, %v2271_v6 }
 0x2ac   :  { %v2296_v54 = vsel %vm2232_vm2, %v2293_v43, 0.0 }
 0x2ad   :  { %v2298_v2 = vadd.f32 %v2297_v62, %v2296_v54 }
 0x2b1   :  { %v2210_v39 = vpop.f32.mrf.mxu2 }
 0x2b2   :  { %v2211_v40 = vadd.f32 %v2210_v39, %v1889_v34 }
 0x2b3   :  { %v2225_v30 = vpop.f32.mrf.mxu3 }
 0x2b4   :  { %v2224_v61 = vadd.f32 %v2223_v49, %v2211_v40 }
 0x2b6   :  { %v2231_v46 = vrot.slane %v2224_v61, 4  ;;  %v2249_v47 = vsub.f32 %v2224_v61, %v2243_v37 }
 0x2b8   :  { %v2235_v52 = vsel %vm2234_vm3, %v2233_v51, %v2231_v46  ;;  %v2252_v53 = vmul.f32 %v2249_v47, %v2249_v47  ;;  %v2270_v4 = vand.u32 2147483647, %v2249_v47 }
 0x2b9   :  { %2237 = vst [vmem:[%s5357_s5] sm:$0x3f] %v2235_v52  ;;  %v2212_v0 = vpop.f32.mrf.mxu2 }
 0x2ba   :  { %v2256_v58 = vsel %vm2232_vm2, %v2252_v53, 0.0  ;;  %v2295_v60 = vmul.f32 %v2289_v45, %v2252_v53  ;;  %v2274_v9 = vsel %vm2232_vm2, %v2270_v4, 0.0 }
 0x2bb   :  { %v2257_v1 = vadd.f32 %v2256_v58, %v2255_v57  ;;  %v2275_v14 = vadd.f32 %v2274_v9, %v2273_v10 }
 0x2bc   :  { %v2299_v63 = vsel %vm2232_vm2, %v2295_v60, 0.0 }
 0x2bd   :  { %2258 = vadd.xlane.f32.xlu0 %v2257_v1  ;;  %v2300_v5 = vadd.f32 %v2299_v63, %v2298_v2 }
 0x2bf   :  { %2301 = vadd.xlane.f32.xlu1 %v2300_v5 }
 0x2c5   :  { %2276 = vadd.xlane.f32.xlu0 %v2275_v14 }
 0x330   :  { %v2259_v11 = vpop.xlane.xlu0 %2258 }
 0x331   :  { %v2260_v12 = vrot.slane %v2259_v11, 4 }
 0x332   :  { %v2302_v15 = vpop.xlane.xlu1 %2301 }
 0x333   :  { %v2261_v16 = vadd.f32 %v2260_v12, %v2259_v11  ;;  %v2303_v17 = vrot.slane %v2302_v15, 4 }
 0x335   :  { %v2262_v13 = vrot.slane %v2261_v16, 2  ;;  %v2304_v18 = vadd.f32 %v2303_v17, %v2302_v15 }
 0x337   :  { %v2263_v19 = vadd.f32 %v2262_v13, %v2261_v16  ;;  %v2305_v20 = vrot.slane %v2304_v18, 2 }
 0x338   :  { %v2277_v21 = vpop.xlane.xlu0 %2276 }
 0x339   :  { %v2278_v22 = vrot.slane %v2277_v21, 4  ;;  %v2264_v23 = vrot.slane %v2263_v19, 1  ;;  %v2306_v26 = vadd.f32 %v2305_v20, %v2304_v18 }
 0x33b   :  { %v2279_v24 = vadd.f32 %v2278_v22, %v2277_v21  ;;  %v2265_v25 = vadd.f32 %v2264_v23, %v2263_v19  ;;  %v2307_v29 = vrot.slane %v2306_v26, 1 }
 0x33d   :  { %v2280_v27 = vrot.slane %v2279_v24, 2  ;;  %3621 = vpush %v2265_v25  ;;  %v2308_v49 = vadd.f32 %v2307_v29, %v2306_v26 }
 0x33f   :  { %v2281_v28 = vadd.f32 %v2280_v27, %v2279_v24 }
 0x341   :  { %v2282_v31 = vrot.slane %v2281_v28, 1 }
 0x343   :  { %v2283_v32 = vadd.f32 %v2282_v31, %v2281_v28 }
 0x345   :  { %3623 = vpush %v2283_v32 }
 0x346   :  { %3625 = vpush %v2308_v49 }
 0x36e   :  { %s3622_s5 = spop %3621 }
 0x36f   :  { %s2267_s26 = smul.f32 0.001908397, %s3622_s5 }
 0x376   :  { %s3624_s27 = spop %3623 }
 0x377   :  { %s2285_s28 = smul.f32 0.001908397, %s3624_s27  ;;  %s3626_s29 = spop %3625 }
 0x378   :  { %s2310_s30 = smul.f32 0.00625, %s3626_s29 }
 0x379   :  { %s2311_s7 = smul.f32 0.5, %s2285_s28 }
 0x37a   :  { %s2313_s2 = smul.f32 0.5, %s2310_s30 }
 0x37b   :  { %s2312_s10 = sadd.f32 %s2311_s7, %s2267_s26 }
 0x37d   :  { %s2314_s11 = sadd.f32 %s2313_s2, %s2312_s10 }
 0x37f   :  { %2316 = sst [smem:[#allocation2]] %s2314_s11 }
 0x380   :  { %2327 = dma.smem_to_hbm %s3642_s12, 16, %s2325_s9, [#allocation3]  }
 0x381   :  { %3640 = dma.done.wait [#allocation3], 16  }
 0x382   :  { %3641 = vsyncadd [#allocation3], 4294967280 }
 0x383   :  { %2334 = sfence }
 0x384   :  { %2335 = vsyncpa [#allocation3], 1 }

</bundles_post_ra>
